<compile_context>
chip_gen: v6e
topology: v6e:2x2x1
jax: 0.10.0
libtpu: 0.0.40
codegen_flags: <defaults>
</compile_context>

<pallas_src>
import functools

import jax
import jax.numpy as jnp
from jax.experimental import pallas as pl
from jax.experimental.pallas import tpu as pltpu


def _model_core_kernel(
    # inputs
    state0_ref, xt_ref, fc_ref, att_feats_ref, p_att_ref,
    w_att_ref, b_att_ref, w_lang_ref, b_lang_ref,
    w_h2att_ref, b_h2att_ref, w_alpha_ref,
    # output
    out_ref,
    # scratch
    state_ref,
    *, rnn_size):
  R = rnn_size
  f32 = jnp.float32
  t = pl.program_id(0)

  # Load the packed initial state [h_att | h_lang | c_att | c_lang] on step 0; afterwards
  # the recurrent state lives in VMEM scratch across grid iterations (no HBM round trip).
  @pl.when(t == 0)
  def _():
    state_ref[...] = state0_ref[...]

  st = state_ref[...]
  h_att_prev = st[:, 0:R]
  h_lang_prev = st[:, R:2 * R]
  c_att_prev = st[:, 2 * R:3 * R]
  c_lang_prev = st[:, 3 * R:4 * R]

  # ---- attention LSTM cell: one fused (B, 3R+E) x (3R+E, 4R) MXU matmul --------------
  x_att = jnp.concatenate(
      [h_lang_prev, fc_ref[...], xt_ref[0], h_att_prev], axis=1)      # (B, 3R+E = 128)
  gates = (jnp.dot(x_att, w_att_ref[...], preferred_element_type=f32)
           + b_att_ref[...])                                          # (B, 4R)
  # Gate columns permuted to [i, f, o, g] at fuse time: one sigmoid over the first 3R
  # columns, one tanh over the last R (instead of two full-width EUP passes).
  sg = jax.nn.sigmoid(gates[:, 0:3 * R])
  g_g = jnp.tanh(gates[:, 3 * R:4 * R])
  i_g, f_g, o_g = sg[:, 0:R], sg[:, R:2 * R], sg[:, 2 * R:3 * R]
  c_att = f_g * c_att_prev + i_g * g_g
  h_att = o_g * jnp.tanh(c_att)

  # ---- attention ------------------------------------------------------------------------
  att_h = (jnp.dot(h_att, w_h2att_ref[...], preferred_element_type=f32)
           + b_h2att_ref[...])                                        # (B, A)
  dot = jnp.tanh(p_att_ref[...] + att_h[:, None, :])                  # (B, L, A)
  # alpha_net bias omitted: softmax(x + c) == softmax(x) (shift invariance), exact.
  logits = jnp.sum(dot * w_alpha_ref[...], axis=-1)                   # (B, L)
  m = jnp.max(logits, axis=1, keepdims=True)
  e = jnp.exp(logits - m)
  denom = jnp.sum(e, axis=1, keepdims=True)
  weight = e * pl.reciprocal(denom, approx=True)                      # softmax over L (EUP)
  # TODO(synk): at production L (~196) / A (512) these sub-128-lane attention
  # intermediates should be padded/flattened lane-dense; at L=16, A=32 they hide
  # under MXU/EUP slack.  att_masks is None in this configuration.
  att_res = jnp.sum(weight[:, :, None] * att_feats_ref[...], axis=1)  # (B, R)

  # ---- language LSTM cell: one fused (B, 4R) x (4R, 4R) MXU matmul -----------------------
  # The 4th activation block (c_lang_prev) hits all-zero weight rows added at fuse time;
  # it only pads the contraction dim to 128 so both fused matmuls share K=N=128 tiling.
  x_lang = jnp.concatenate([att_res, h_att, h_lang_prev, c_lang_prev], axis=1)
  gates_l = (jnp.dot(x_lang, w_lang_ref[...], preferred_element_type=f32)
             + b_lang_ref[...])                                       # (B, 4R)
  sg2 = jax.nn.sigmoid(gates_l[:, 0:3 * R])
  g2 = jnp.tanh(gates_l[:, 3 * R:4 * R])
  i2, f2, o2 = sg2[:, 0:R], sg2[:, R:2 * R], sg2[:, 2 * R:3 * R]
  c_lang = f2 * c_lang_prev + i2 * g2
  h_lang = o2 * jnp.tanh(c_lang)

  # TODO(synk): F.dropout on h_lang is identity in eval mode; PyTorch training-mode
  # dropout RNG cannot be matched bit-for-bit.
  new_state = jnp.concatenate([h_att, h_lang, c_att, c_lang], axis=1)  # lane-dense (B, 128)
  state_ref[...] = new_state
  out_ref[0] = new_state


def _permute_gate_cols(w, rnn_size):
  """PyTorch LSTMCell gate order [i, f, g, o] -> [i, f, o, g] along the last axis."""
  R = rnn_size
  return jnp.concatenate(
      [w[..., 0:2 * R], w[..., 3 * R:4 * R], w[..., 2 * R:3 * R]], axis=-1)


def fuse_params(params, rnn_size):
  """One-time weight stacking / gate permutation / K-padding for the fused matmuls."""
  R = rnn_size
  # rows: [h_lang_prev(R) | fc(R) | xt(E) | h_att_prev(R)] -> (3R+E, 4R)
  w_att_full = jnp.concatenate(
      [_permute_gate_cols(params["w_ih_att_t"], R),
       _permute_gate_cols(params["w_hh_att_t"], R)], axis=0)
  # rows: [att_res(R) | h_att(R) | h_lang_prev(R) | ZERO pad(R)] -> (4R, 4R), K padded to 128
  w_lang_full = jnp.concatenate(
      [_permute_gate_cols(params["w_ih_lang_t"], R),
       _permute_gate_cols(params["w_hh_lang_t"], R),
       jnp.zeros((R, 4 * R), jnp.float32)], axis=0)
  return {
      "w_att_full": w_att_full,
      "b_att": _permute_gate_cols(params["b_att"], R),
      "w_lang_full": w_lang_full,
      "b_lang": _permute_gate_cols(params["b_lang"], R),
      "w_h2att_t": params["w_h2att_t"],
      "b_h2att": params["b_h2att"],
      "w_alpha": params["w_alpha"],
      # b_alpha intentionally dropped: cancels under softmax.
  }


def model_core_decode(xt_seq, fc_feats, att_feats, p_att_feats, state, fused):
  """Run T ModelCore.forward steps inside ONE pallas_call.

  xt_seq: (T, B, E).  Returns (h_lang_seq (T, B, R), (h_stack, c_stack)) where the final
  state matches the PyTorch (2, B, R) layout.  `output` per step == h_lang (eval-mode
  dropout is identity).
  """
  h0, c0 = state
  T, B, E = xt_seq.shape
  R = fc_feats.shape[1]
  L = att_feats.shape[1]
  A = p_att_feats.shape[2]

  # Packed lane-dense initial state [h_att | h_lang | c_att | c_lang]  (B, 4R).
  state0 = jnp.concatenate([h0[0], h0[1], c0[0], c0[1]], axis=1)

  def const(shape):
    return pl.BlockSpec(shape, lambda t: (0,) * len(shape))

  kernel = functools.partial(_model_core_kernel, rnn_size=R)
  grid_spec = pltpu.PrefetchScalarGridSpec(
      num_scalar_prefetch=0,
      grid=(T,),
      in_specs=[
          const((B, 4 * R)),                                  # state0 (resident)
          pl.BlockSpec((1, B, E), lambda t: (t, 0, 0)),       # xt per-step slice
          const((B, R)),                                      # fc_feats (resident)
          const((B, L, R)),                                   # att_feats (resident)
          const((B, L, A)),                                   # p_att_feats (resident)
          const(fused["w_att_full"].shape),                   # weights: resident in VMEM
          const(fused["b_att"].shape),
          const(fused["w_lang_full"].shape),
          const(fused["b_lang"].shape),
          const(fused["w_h2att_t"].shape),
          const(fused["b_h2att"].shape),
          const(fused["w_alpha"].shape),
      ],
      out_specs=pl.BlockSpec((1, B, 4 * R), lambda t: (t, 0, 0)),
      scratch_shapes=[pltpu.VMEM((B, 4 * R), jnp.float32)],   # recurrent state carry
  )
  packed_seq = pl.pallas_call(
      kernel,
      out_shape=jax.ShapeDtypeStruct((T, B, 4 * R), jnp.float32),
      grid_spec=grid_spec,
      compiler_params=pltpu.CompilerParams(
          dimension_semantics=("arbitrary",)),   # sequential recurrence over tokens
  )(state0, xt_seq, fc_feats, att_feats, p_att_feats,
    fused["w_att_full"], fused["b_att"], fused["w_lang_full"], fused["b_lang"],
    fused["w_h2att_t"], fused["b_h2att"], fused["w_alpha"])

  h_lang_seq = packed_seq[:, :, R:2 * R]
  last = packed_seq[T - 1]
  h_stack = jnp.stack([last[:, 0:R], last[:, R:2 * R]])
  c_stack = jnp.stack([last[:, 2 * R:3 * R], last[:, 3 * R:4 * R]])
  return h_lang_seq, (h_stack, c_stack)


def model_core_forward(xt, fc_feats, att_feats, p_att_feats, state, fused):
  """Single-step interface identical to ModelCore.forward (T == 1 decode)."""
  h_seq, new_state = model_core_decode(
      xt[None], fc_feats, att_feats, p_att_feats, state, fused)
  return h_seq[0], new_state


# --------------------------- pure-JAX reference ----------------------------------------
def _lstm_cell_ref(x, h, c, w_ih_t, w_hh_t, b):
  R = h.shape[1]
  gates = x @ w_ih_t + h @ w_hh_t + b
  i = jax.nn.sigmoid(gates[:, :R])
  f = jax.nn.sigmoid(gates[:, R:2 * R])
  g = jnp.tanh(gates[:, 2 * R:3 * R])
  o = jax.nn.sigmoid(gates[:, 3 * R:])
  c2 = f * c + i * g
  return o * jnp.tanh(c2), c2


def model_core_reference(xt, fc_feats, att_feats, p_att_feats, state, params):
  h_prev, c_prev = state
  x = jnp.concatenate([h_prev[-1], fc_feats, xt], axis=1)
  h_att, c_att = _lstm_cell_ref(x, h_prev[0], c_prev[0],
                                params["w_ih_att_t"], params["w_hh_att_t"],
                                params["b_att"])
  att_h = h_att @ params["w_h2att_t"] + params["b_h2att"]
  dot = jnp.tanh(p_att_feats + att_h[:, None, :])
  logits = jnp.sum(dot * params["w_alpha"], axis=-1) + params["b_alpha"][0, 0]
  w = jax.nn.softmax(logits, axis=1)
  att_res = jnp.einsum("bl,blr->br", w, att_feats)
  x2 = jnp.concatenate([att_res, h_att], axis=1)
  h_lang, c_lang = _lstm_cell_ref(x2, h_prev[1], c_prev[1],
                                  params["w_ih_lang_t"], params["w_hh_lang_t"],
                                  params["b_lang"])
  return h_lang, jnp.stack([h_att, h_lang]), jnp.stack([c_att, c_lang])


# ----------------------------------- main ------------------------------------------------
def _uniform(key, shape, scale):
  return jax.random.uniform(key, shape, jnp.float32, -scale, scale)


if __name__ == "__main__":
  # Small deterministic configuration. 3R + E = 128 -> fully fused att-LSTM matmul.
  B = 8          # batch
  E = 32         # input_encoding_size
  R = 32         # rnn_size
  A = 32         # att_hid_size
  L = 16         # att_size (spatial locations)
  T = 4          # decode steps fused into one pallas_call

  root = jax.random.PRNGKey(0)
  keys = jax.random.split(root, 20)

  kl = 1.0 / jnp.sqrt(R)     # LSTMCell init scale
  kh = 1.0 / jnp.sqrt(R)     # h2att: in_features = R
  ka = 1.0 / jnp.sqrt(A)     # alpha_net: in_features = A

  params = {
      # att LSTM: input = 2R + E, hidden = R.  W^T shapes, combined bias, [i,f,g,o] cols.
      "w_ih_att_t": _uniform(keys[0], (2 * R + E, 4 * R), kl),
      "w_hh_att_t": _uniform(keys[1], (R, 4 * R), kl),
      "b_att": (_uniform(keys[2], (1, 4 * R), kl)
                + _uniform(keys[3], (1, 4 * R), kl)),
      # lang LSTM: input = 2R, hidden = R.
      "w_ih_lang_t": _uniform(keys[4], (2 * R, 4 * R), kl),
      "w_hh_lang_t": _uniform(keys[5], (R, 4 * R), kl),
      "b_lang": (_uniform(keys[6], (1, 4 * R), kl)
                 + _uniform(keys[7], (1, 4 * R), kl)),
      # attention
      "w_h2att_t": _uniform(keys[8], (R, A), kh),
      "b_h2att": _uniform(keys[9], (1, A), kh),
      "w_alpha": _uniform(keys[10], (1, 1, A), ka),   # alpha_net weight (1, A) as (1,1,A)
      "b_alpha": _uniform(keys[11], (1, 1), ka),      # used only by the reference
  }
  fused = fuse_params(params, R)   # one-time stacking / gate permutation / K padding

  xt_seq = jax.random.normal(keys[12], (T, B, E), jnp.float32)
  fc_feats = jax.random.normal(keys[13], (B, R), jnp.float32)
  att_feats = jax.random.normal(keys[14], (B, L, R), jnp.float32)
  p_att_feats = jax.random.normal(keys[15], (B, L, A), jnp.float32)
  h0 = jax.random.normal(keys[16], (2, B, R), jnp.float32)
  c0 = jax.random.normal(keys[17], (2, B, R), jnp.float32)
  state = (h0, c0)

  # ---- multi-token decode: recurrence fused inside one pallas_call ----
  h_seq, (h_new, c_new) = model_core_decode(
      xt_seq, fc_feats, att_feats, p_att_feats, state, fused)
  jax.block_until_ready((h_seq, h_new, c_new))

  # reference: T sequential single-step module forwards (keeps b_alpha, exact divide)
  h_r, c_r = h0, c0
  ref_outs = []
  for step in range(T):
    o_r, h_r, c_r = model_core_reference(
        xt_seq[step], fc_feats, att_feats, p_att_feats, (h_r, c_r), params)
    ref_outs.append(o_r)
  ref_seq = jnp.stack(ref_outs)

  # Tolerance widened slightly vs float eps for the EUP approximate-reciprocal softmax;
  # gate-permutation or fusion bugs would produce O(0.1) errors and still be caught.
  assert jnp.allclose(h_seq, ref_seq, atol=2e-3, rtol=2e-3)
  assert jnp.allclose(h_new, h_r, atol=2e-3, rtol=2e-3)
  assert jnp.allclose(c_new, c_r, atol=2e-3, rtol=2e-3)

  # ---- single-step ModelCore.forward interface (T == 1) ----
  out1, (h1, c1) = model_core_forward(
      xt_seq[0], fc_feats, att_feats, p_att_feats, state, fused)
  jax.block_until_ready((out1, h1, c1))
  o_ref, hs_ref, cs_ref = model_core_reference(
      xt_seq[0], fc_feats, att_feats, p_att_feats, state, params)
  assert jnp.allclose(out1, o_ref, atol=2e-3, rtol=2e-3)
  assert jnp.allclose(h1, hs_ref, atol=2e-3, rtol=2e-3)
  assert jnp.allclose(c1, cs_ref, atol=2e-3, rtol=2e-3)

  print("KERNEL_OK")
</pallas_src>

<mosaic_0001>
module attributes {stable_mosaic.version = 11 : i64} {
  func.func @_model_core_kernel(%arg0: i32, %arg1: memref<8x128xf32, #tpu.memory_space<vmem>>, %arg2: memref<1x8x32xf32, #tpu.memory_space<vmem>>, %arg3: memref<8x32xf32, #tpu.memory_space<vmem>>, %arg4: memref<8x16x32xf32, #tpu.memory_space<vmem>>, %arg5: memref<8x16x32xf32, #tpu.memory_space<vmem>>, %arg6: memref<128x128xf32, #tpu.memory_space<vmem>>, %arg7: memref<1x128xf32, #tpu.memory_space<vmem>>, %arg8: memref<128x128xf32, #tpu.memory_space<vmem>>, %arg9: memref<1x128xf32, #tpu.memory_space<vmem>>, %arg10: memref<32x32xf32, #tpu.memory_space<vmem>>, %arg11: memref<1x32xf32, #tpu.memory_space<vmem>>, %arg12: memref<1x1x32xf32, #tpu.memory_space<vmem>>, %arg13: memref<1x8x128xf32, #tpu.memory_space<vmem>>, %arg14: memref<8x128xf32, #tpu.memory_space<vmem>>) attributes {dimension_semantics = [#tpu.dimension_semantics<arbitrary>], iteration_bounds = array<i64: 4>, scalar_prefetch = 0 : i64, scratch_operands = 1 : i64, tpu.core_type = #tpu.core_type<tc>, window_params = [{pipeline_mode = #tpu.pipeline_mode<synchronous>, transform_indices = @transform_0, window_bounds = array<i64: 8, 128>}, {transform_indices = @transform_1, window_bounds = array<i64: 1, 8, 32>}, {pipeline_mode = #tpu.pipeline_mode<synchronous>, transform_indices = @transform_2, window_bounds = array<i64: 8, 32>}, {pipeline_mode = #tpu.pipeline_mode<synchronous>, transform_indices = @transform_3, window_bounds = array<i64: 8, 16, 32>}, {pipeline_mode = #tpu.pipeline_mode<synchronous>, transform_indices = @transform_4, window_bounds = array<i64: 8, 16, 32>}, {pipeline_mode = #tpu.pipeline_mode<synchronous>, transform_indices = @transform_5, window_bounds = array<i64: 128, 128>}, {pipeline_mode = #tpu.pipeline_mode<synchronous>, transform_indices = @transform_6, window_bounds = array<i64: 1, 128>}, {pipeline_mode = #tpu.pipeline_mode<synchronous>, transform_indices = @transform_7, window_bounds = array<i64: 128, 128>}, {pipeline_mode = #tpu.pipeline_mode<synchronous>, transform_indices = @transform_8, window_bounds = array<i64: 1, 128>}, {pipeline_mode = #tpu.pipeline_mode<synchronous>, transform_indices = @transform_9, window_bounds = array<i64: 32, 32>}, {pipeline_mode = #tpu.pipeline_mode<synchronous>, transform_indices = @transform_10, window_bounds = array<i64: 1, 32>}, {pipeline_mode = #tpu.pipeline_mode<synchronous>, transform_indices = @transform_11, window_bounds = array<i64: 1, 1, 32>}, {transform_indices = @transform_12, window_bounds = array<i64: 1, 8, 128>}]} {
    %c0_i32 = arith.constant 0 : i32
    %0 = arith.cmpi eq, %arg0, %c0_i32 : i32
    %1 = arith.extui %0 : i1 to i32
    %c0_i32_0 = arith.constant 0 : i32
    %2 = arith.cmpi ne, %1, %c0_i32_0 : i32
    scf.if %2 {
      %c0_41 = arith.constant 0 : index
      %c0_42 = arith.constant 0 : index
      %89 = vector.load %arg1[%c0_41, %c0_42] : memref<8x128xf32, #tpu.memory_space<vmem>>, vector<8x128xf32>
      %c0_43 = arith.constant 0 : index
      %c0_44 = arith.constant 0 : index
      %90 = vector.load %arg14[%c0_43, %c0_44] : memref<8x128xf32, #tpu.memory_space<vmem>>, vector<8x128xf32>
      tpu.vector_store %arg14[%c0_43, %c0_44], %89 {strides = array<i32>} : memref<8x128xf32, #tpu.memory_space<vmem>>, vector<8x128xf32>,
    } else {
    }
    %c0 = arith.constant 0 : index
    %c0_1 = arith.constant 0 : index
    %3 = vector.load %arg14[%c0, %c0_1] : memref<8x128xf32, #tpu.memory_space<vmem>>, vector<8x128xf32>
    %4 = vector.extract_strided_slice %3 {offsets = [0, 0], sizes = [8, 32], strides = [1, 1]} : vector<8x128xf32> to vector<8x32xf32>
    %5 = vector.extract_strided_slice %3 {offsets = [0, 32], sizes = [8, 32], strides = [1, 1]} : vector<8x128xf32> to vector<8x32xf32>
    %6 = vector.extract_strided_slice %3 {offsets = [0, 64], sizes = [8, 32], strides = [1, 1]} : vector<8x128xf32> to vector<8x32xf32>
    %7 = vector.extract_strided_slice %3 {offsets = [0, 96], sizes = [8, 32], strides = [1, 1]} : vector<8x128xf32> to vector<8x32xf32>
    %c0_2 = arith.constant 0 : index
    %c0_3 = arith.constant 0 : index
    %8 = vector.load %arg3[%c0_2, %c0_3] : memref<8x32xf32, #tpu.memory_space<vmem>>, vector<8x32xf32>
    %c0_4 = arith.constant 0 : index
    %c0_5 = arith.constant 0 : index
    %c0_6 = arith.constant 0 : index
    %9 = vector.load %arg2[%c0_4, %c0_5, %c0_6] : memref<1x8x32xf32, #tpu.memory_space<vmem>>, vector<1x8x32xf32>
    %10 = vector.shape_cast %9 : vector<1x8x32xf32> to vector<8x32xf32>
    %11 = tpu.concatenate %5, %8, %10, %4 in 1 : vector<8x32xf32>, vector<8x32xf32>, vector<8x32xf32>, vector<8x32xf32> -> vector<8x128xf32>
    %c0_7 = arith.constant 0 : index
    %c0_8 = arith.constant 0 : index
    %12 = vector.load %arg6[%c0_7, %c0_8] : memref<128x128xf32, #tpu.memory_space<vmem>>, vector<128x128xf32>
    %cst = arith.constant dense<0.000000e+00> : vector<8x128xf32>
    %13 = tpu.matmul %11, %12, %cst {dimension_numbers = #tpu.dot_dimension_numbers<[1], [0], [0], [1], [0, 0, 1, 1], [], []>} : vector<8x128xf32>, vector<128x128xf32>, vector<8x128xf32> -> vector<8x128xf32>
    %c0_9 = arith.constant 0 : index
    %c0_10 = arith.constant 0 : index
    %14 = vector.load %arg7[%c0_9, %c0_10] : memref<1x128xf32, #tpu.memory_space<vmem>>, vector<1x128xf32>
    %15 = vector.broadcast %14 : vector<1x128xf32> to vector<8x128xf32>
    %16 = arith.addf %13, %15 : vector<8x128xf32>
    %17 = vector.extract_strided_slice %16 {offsets = [0, 0], sizes = [8, 96], strides = [1, 1]} : vector<8x128xf32> to vector<8x96xf32>
    %18 = arith.negf %17 : vector<8x96xf32>
    %19 = math.exp %18 : vector<8x96xf32>
    %cst_11 = arith.constant 1.000000e+00 : f32
    %20 = vector.broadcast %cst_11 : f32 to vector<8x96xf32>
    %21 = arith.addf %20, %19 : vector<8x96xf32>
    %22 = arith.divf %20, %21 : vector<8x96xf32>
    %23 = vector.extract_strided_slice %16 {offsets = [0, 96], sizes = [8, 32], strides = [1, 1]} : vector<8x128xf32> to vector<8x32xf32>
    %24 = math.tanh %23 : vector<8x32xf32>
    %25 = vector.extract_strided_slice %22 {offsets = [0, 0], sizes = [8, 32], strides = [1, 1]} : vector<8x96xf32> to vector<8x32xf32>
    %26 = vector.extract_strided_slice %22 {offsets = [0, 32], sizes = [8, 32], strides = [1, 1]} : vector<8x96xf32> to vector<8x32xf32>
    %27 = vector.extract_strided_slice %22 {offsets = [0, 64], sizes = [8, 32], strides = [1, 1]} : vector<8x96xf32> to vector<8x32xf32>
    %28 = arith.mulf %26, %6 : vector<8x32xf32>
    %29 = arith.mulf %25, %24 : vector<8x32xf32>
    %30 = arith.addf %28, %29 : vector<8x32xf32>
    %31 = math.tanh %30 : vector<8x32xf32>
    %32 = arith.mulf %27, %31 : vector<8x32xf32>
    %c0_12 = arith.constant 0 : index
    %c0_13 = arith.constant 0 : index
    %33 = vector.load %arg10[%c0_12, %c0_13] : memref<32x32xf32, #tpu.memory_space<vmem>>, vector<32x32xf32>
    %cst_14 = arith.constant dense<0.000000e+00> : vector<8x32xf32>
    %34 = tpu.matmul %32, %33, %cst_14 {dimension_numbers = #tpu.dot_dimension_numbers<[1], [0], [0], [1], [0, 0, 1, 1], [], []>} : vector<8x32xf32>, vector<32x32xf32>, vector<8x32xf32> -> vector<8x32xf32>
    %c0_15 = arith.constant 0 : index
    %c0_16 = arith.constant 0 : index
    %35 = vector.load %arg11[%c0_15, %c0_16] : memref<1x32xf32, #tpu.memory_space<vmem>>, vector<1x32xf32>
    %36 = vector.broadcast %35 : vector<1x32xf32> to vector<8x32xf32>
    %37 = arith.addf %34, %36 : vector<8x32xf32>
    %c0_17 = arith.constant 0 : index
    %c0_18 = arith.constant 0 : index
    %c0_19 = arith.constant 0 : index
    %38 = vector.load %arg5[%c0_17, %c0_18, %c0_19] : memref<8x16x32xf32, #tpu.memory_space<vmem>>, vector<8x16x32xf32>
    %39 = vector.shape_cast %37 : vector<8x32xf32> to vector<8x1x32xf32>
    %40 = vector.broadcast %39 : vector<8x1x32xf32> to vector<8x16x32xf32>
    %41 = arith.addf %38, %40 : vector<8x16x32xf32>
    %42 = math.tanh %41 : vector<8x16x32xf32>
    %c0_20 = arith.constant 0 : index
    %c0_21 = arith.constant 0 : index
    %c0_22 = arith.constant 0 : index
    %43 = vector.load %arg12[%c0_20, %c0_21, %c0_22] : memref<1x1x32xf32, #tpu.memory_space<vmem>>, vector<1x1x32xf32>
    %44 = vector.broadcast %43 : vector<1x1x32xf32> to vector<8x16x32xf32>
    %45 = arith.mulf %42, %44 : vector<8x16x32xf32>
    %cst_23 = arith.constant dense<0.000000e+00> : vector<8x16xf32>
    %46 = vector.multi_reduction <add>, %45, %cst_23 [2] : vector<8x16x32xf32> to vector<8x16xf32>
    %cst_24 = arith.constant dense<0xFF800000> : vector<8xf32>
    %47 = vector.multi_reduction <maximumf>, %46, %cst_24 [1] : vector<8x16xf32> to vector<8xf32>
    %48 = vector.shape_cast %47 : vector<8xf32> to vector<8x1xf32>
    %49 = vector.broadcast %48 : vector<8x1xf32> to vector<8x16xf32>
    %50 = arith.subf %46, %49 : vector<8x16xf32>
    %51 = math.exp %50 : vector<8x16xf32>
    %cst_25 = arith.constant dense<0.000000e+00> : vector<8xf32>
    %52 = vector.multi_reduction <add>, %51, %cst_25 [1] : vector<8x16xf32> to vector<8xf32>
    %53 = vector.shape_cast %52 : vector<8xf32> to vector<8x1xf32>
    %54 = tpu.reciprocal %53 {approx = true} : vector<8x1xf32> -> vector<8x1xf32>
    %55 = vector.broadcast %54 : vector<8x1xf32> to vector<8x16xf32>
    %56 = arith.mulf %51, %55 : vector<8x16xf32>
    %57 = vector.shape_cast %56 : vector<8x16xf32> to vector<8x16x1xf32>
    %c0_26 = arith.constant 0 : index
    %c0_27 = arith.constant 0 : index
    %c0_28 = arith.constant 0 : index
    %58 = vector.load %arg4[%c0_26, %c0_27, %c0_28] : memref<8x16x32xf32, #tpu.memory_space<vmem>>, vector<8x16x32xf32>
    %59 = vector.broadcast %57 : vector<8x16x1xf32> to vector<8x16x32xf32>
    %60 = arith.mulf %59, %58 : vector<8x16x32xf32>
    %cst_29 = arith.constant dense<0.000000e+00> : vector<8x32xf32>
    %61 = vector.multi_reduction <add>, %60, %cst_29 [1] : vector<8x16x32xf32> to vector<8x32xf32>
    %62 = tpu.concatenate %61, %32, %5, %7 in 1 : vector<8x32xf32>, vector<8x32xf32>, vector<8x32xf32>, vector<8x32xf32> -> vector<8x128xf32>
    %c0_30 = arith.constant 0 : index
    %c0_31 = arith.constant 0 : index
    %63 = vector.load %arg8[%c0_30, %c0_31] : memref<128x128xf32, #tpu.memory_space<vmem>>, vector<128x128xf32>
    %cst_32 = arith.constant dense<0.000000e+00> : vector<8x128xf32>
    %64 = tpu.matmul %62, %63, %cst_32 {dimension_numbers = #tpu.dot_dimension_numbers<[1], [0], [0], [1], [0, 0, 1, 1], [], []>} : vector<8x128xf32>, vector<128x128xf32>, vector<8x128xf32> -> vector<8x128xf32>
    %c0_33 = arith.constant 0 : index
    %c0_34 = arith.constant 0 : index
    %65 = vector.load %arg9[%c0_33, %c0_34] : memref<1x128xf32, #tpu.memory_space<vmem>>, vector<1x128xf32>
    %66 = vector.broadcast %65 : vector<1x128xf32> to vector<8x128xf32>
    %67 = arith.addf %64, %66 : vector<8x128xf32>
    %68 = vector.extract_strided_slice %67 {offsets = [0, 0], sizes = [8, 96], strides = [1, 1]} : vector<8x128xf32> to vector<8x96xf32>
    %69 = arith.negf %68 : vector<8x96xf32>
    %70 = math.exp %69 : vector<8x96xf32>
    %cst_35 = arith.constant 1.000000e+00 : f32
    %71 = vector.broadcast %cst_35 : f32 to vector<8x96xf32>
    %72 = arith.addf %71, %70 : vector<8x96xf32>
    %73 = arith.divf %71, %72 : vector<8x96xf32>
    %74 = vector.extract_strided_slice %67 {offsets = [0, 96], sizes = [8, 32], strides = [1, 1]} : vector<8x128xf32> to vector<8x32xf32>
    %75 = math.tanh %74 : vector<8x32xf32>
    %76 = vector.extract_strided_slice %73 {offsets = [0, 0], sizes = [8, 32], strides = [1, 1]} : vector<8x96xf32> to vector<8x32xf32>
    %77 = vector.extract_strided_slice %73 {offsets = [0, 32], sizes = [8, 32], strides = [1, 1]} : vector<8x96xf32> to vector<8x32xf32>
    %78 = vector.extract_strided_slice %73 {offsets = [0, 64], sizes = [8, 32], strides = [1, 1]} : vector<8x96xf32> to vector<8x32xf32>
    %79 = arith.mulf %77, %7 : vector<8x32xf32>
    %80 = arith.mulf %76, %75 : vector<8x32xf32>
    %81 = arith.addf %79, %80 : vector<8x32xf32>
    %82 = math.tanh %81 : vector<8x32xf32>
    %83 = arith.mulf %78, %82 : vector<8x32xf32>
    %84 = tpu.concatenate %32, %83, %30, %81 in 1 : vector<8x32xf32>, vector<8x32xf32>, vector<8x32xf32>, vector<8x32xf32> -> vector<8x128xf32>
    %c0_36 = arith.constant 0 : index
    %c0_37 = arith.constant 0 : index
    %85 = vector.load %arg14[%c0_36, %c0_37] : memref<8x128xf32, #tpu.memory_space<vmem>>, vector<8x128xf32>
    tpu.vector_store %arg14[%c0_36, %c0_37], %84 {strides = array<i32>} : memref<8x128xf32, #tpu.memory_space<vmem>>, vector<8x128xf32>,
    %c0_38 = arith.constant 0 : index
    %c0_39 = arith.constant 0 : index
    %c0_40 = arith.constant 0 : index
    %86 = vector.load %arg13[%c0_38, %c0_39, %c0_40] : memref<1x8x128xf32, #tpu.memory_space<vmem>>, vector<1x8x128xf32>
    %87 = vector.shape_cast %86 : vector<1x8x128xf32> to vector<8x128xf32>
    %88 = vector.shape_cast %84 : vector<8x128xf32> to vector<1x8x128xf32>
    tpu.vector_store %arg13[%c0_38, %c0_39, %c0_40], %88 {strides = array<i32>} : memref<1x8x128xf32, #tpu.memory_space<vmem>>, vector<1x8x128xf32>,
    return
  }
  func.func @transform_0(%arg0: i32) -> (i32, i32) {
    %c0_i32 = arith.constant 0 : i32
    %c0_i32_0 = arith.constant 0 : i32
    %c0_i32_1 = arith.constant 0 : i32
    return %c0_i32, %c0_i32_0 : i32, i32
  }
  func.func @transform_1(%arg0: i32) -> (i32, i32, i32) {
    %c0_i32 = arith.constant 0 : i32
    %c0_i32_0 = arith.constant 0 : i32
    %c0_i32_1 = arith.constant 0 : i32
    return %arg0, %c0_i32, %c0_i32_0 : i32, i32, i32
  }
  func.func @transform_2(%arg0: i32) -> (i32, i32) {
    %c0_i32 = arith.constant 0 : i32
    %c0_i32_0 = arith.constant 0 : i32
    %c0_i32_1 = arith.constant 0 : i32
    return %c0_i32, %c0_i32_0 : i32, i32
  }
  func.func @transform_3(%arg0: i32) -> (i32, i32, i32) {
    %c0_i32 = arith.constant 0 : i32
    %c0_i32_0 = arith.constant 0 : i32
    %c0_i32_1 = arith.constant 0 : i32
    %c0_i32_2 = arith.constant 0 : i32
    return %c0_i32, %c0_i32_0, %c0_i32_1 : i32, i32, i32
  }
  func.func @transform_4(%arg0: i32) -> (i32, i32, i32) {
    %c0_i32 = arith.constant 0 : i32
    %c0_i32_0 = arith.constant 0 : i32
    %c0_i32_1 = arith.constant 0 : i32
    %c0_i32_2 = arith.constant 0 : i32
    return %c0_i32, %c0_i32_0, %c0_i32_1 : i32, i32, i32
  }
  func.func @transform_5(%arg0: i32) -> (i32, i32) {
    %c0_i32 = arith.constant 0 : i32
    %c0_i32_0 = arith.constant 0 : i32
    %c0_i32_1 = arith.constant 0 : i32
    return %c0_i32, %c0_i32_0 : i32, i32
  }
  func.func @transform_6(%arg0: i32) -> (i32, i32) {
    %c0_i32 = arith.constant 0 : i32
    %c0_i32_0 = arith.constant 0 : i32
    %c0_i32_1 = arith.constant 0 : i32
    return %c0_i32, %c0_i32_0 : i32, i32
  }
  func.func @transform_7(%arg0: i32) -> (i32, i32) {
    %c0_i32 = arith.constant 0 : i32
    %c0_i32_0 = arith.constant 0 : i32
    %c0_i32_1 = arith.constant 0 : i32
    return %c0_i32, %c0_i32_0 : i32, i32
  }
  func.func @transform_8(%arg0: i32) -> (i32, i32) {
    %c0_i32 = arith.constant 0 : i32
    %c0_i32_0 = arith.constant 0 : i32
    %c0_i32_1 = arith.constant 0 : i32
    return %c0_i32, %c0_i32_0 : i32, i32
  }
  func.func @transform_9(%arg0: i32) -> (i32, i32) {
    %c0_i32 = arith.constant 0 : i32
    %c0_i32_0 = arith.constant 0 : i32
    %c0_i32_1 = arith.constant 0 : i32
    return %c0_i32, %c0_i32_0 : i32, i32
  }
  func.func @transform_10(%arg0: i32) -> (i32, i32) {
    %c0_i32 = arith.constant 0 : i32
    %c0_i32_0 = arith.constant 0 : i32
    %c0_i32_1 = arith.constant 0 : i32
    return %c0_i32, %c0_i32_0 : i32, i32
  }
  func.func @transform_11(%arg0: i32) -> (i32, i32, i32) {
    %c0_i32 = arith.constant 0 : i32
    %c0_i32_0 = arith.constant 0 : i32
    %c0_i32_1 = arith.constant 0 : i32
    %c0_i32_2 = arith.constant 0 : i32
    return %c0_i32, %c0_i32_0, %c0_i32_1 : i32, i32, i32
  }
  func.func @transform_12(%arg0: i32) -> (i32, i32, i32) {
    %c0_i32 = arith.constant 0 : i32
    %c0_i32_0 = arith.constant 0 : i32
    %c0_i32_1 = arith.constant 0 : i32
    return %arg0, %c0_i32, %c0_i32_0 : i32, i32, i32
  }
}

</mosaic_0001>

<bundles_post_ra>
// kernel: tpu_custom_call.1
= control target key start
LH: loop header
LB: loop body
LE: loop exit
PB: predicated region body
PF: predicated region fallthrough
CT: control target
= control target key end

     0   :  { %s3283_s0 = inlined_call_operand.hbm [shape: f32[8,128], index: 0, kind: input, shape index: {}]   ;;  %s3284_s1 = inlined_call_operand.hbm [shape: f32[4,8,32], index: 1, kind: input, shape index: {}]   ;;  %s3285_s2 = inlined_call_operand.hbm [shape: f32[8,32], index: 2, kind: input, shape index: {}]   ;;  %s3286_s3 = inlined_call_operand.hbm [shape: f32[8,16,32], index: 3, kind: input, shape index: {}]   ;;  %s3287_s4 = inlined_call_operand.hbm [shape: f32[8,16,32], index: 4, kind: input, shape index: {}]   ;;  %s3288_s5 = inlined_call_operand.hbm [shape: f32[128,128], index: 5, kind: input, shape index: {}]   ;;  %s3289_s6 = inlined_call_operand.vmem [shape: f32[1,128], index: 6, kind: input, shape index: {}]   ;;  %s3290_s7 = inlined_call_operand.hbm [shape: f32[128,128], index: 7, kind: input, shape index: {}]   ;;  %s3291_s8 = inlined_call_operand.vmem [shape: f32[1,128], index: 8, kind: input, shape index: {}]   ;;  %s3292_s9 = inlined_call_operand.hbm [shape: f32[32,32], index: 9, kind: input, shape index: {}]   ;;  %s3293_s10 = inlined_call_operand.vmem [shape: f32[1,32], index: 10, kind: input, shape index: {}]   ;;  %s3294_s11 = inlined_call_operand.vmem [shape: f32[1,1,32], index: 11, kind: input, shape index: {}]   ;;  %s3295_s12 = inlined_call_operand.hbm [shape: f32[4,8,128], index: 12, kind: output, shape index: {}]  }
   0x1   :  { %3300 = sst [smem:[#allocation25_spill]] %s3283_s0 }
   0x2   :  { %3301 = sst [smem:[#allocation26_spill]] %s3285_s2 }
   0x3   :  { %3302 = sst [smem:[#allocation27_spill]] %s3286_s3 }
   0x4   :  { %3303 = sst [smem:[#allocation28_spill]] %s3287_s4 }
   0x5   :  { %3304 = sst [smem:[#allocation29_spill]] %s3288_s5 }
   0x6   :  { %3305 = sst [smem:[#allocation30_spill]] %s3290_s7 }
   0x7   :  { %3306 = sst [smem:[#allocation31_spill]] %s3292_s9 }
   0x8   :  { %17 = vsyncpa [#allocation4], 0 }
   0x9   :  { %18 = vsyncpa [#allocation7], 0 }
   0xa   :  { %20 = vsyncpa [#allocation7 + $0x1], 0 }
   0xb   :  { %21 = vsyncpa [#allocation10], 0 }
   0xc   :  { %22 = vsyncpa [#allocation13], 0 }
   0xd   :  { %23 = vsyncpa [#allocation16], 0 }
   0xe   :  { %24 = vsyncpa [#allocation5], 0 }
   0xf   :  { %26 = vsyncpa [#allocation5 + $0x1], 0  ;;  %s2615_s21 = smov 0   ;;  %s2617_s22 = smov 0  }
  0x10   :  { %s2619_s23 = smov 0   ;;  %s2621_s24 = smov 0  }
  0x11 LB: > { %s2532_s25 = smov [#allocation8]   ;;  %s2636_s27 = sadd.s32 4294967295, %s2530_s24   ;;  %s2530_s24 = sphi %s2621_s24, %s3340_s24   ;;  %s2526_s23 = sphi %s2619_s23, %s3339_s23   ;;  %s2522_s22 = sphi %s2617_s22, %s3338_s22   ;;  %s2518_s21 = sphi %s2615_s21, %s3337_s21  }
  0x12   : > { %s344_s26 = sshll.u32 %s2532_s25, 4  ;;  %p1872_p0 = scmp.ge.s32.totalorder %s2530_s24, 1  ;;  %s345_s26 = int_to_ptr.vmem [resolvable:$true] %s344_s26 }
  0x13   : > { %p3296_p1 = scmp.eq.s32.totalorder %s2636_s27, 0  ;;  %p320_p2 = scmp.lt.s32.totalorder %s2530_s24, 5 }
  0x14   : > { %s2533_s29 = smov [#allocation9]   ;;  %s2534_s14 = smov [#allocation12]  }
  0x15   : > { %p2642_p4 = pnand %p1872_p0, %p320_p2  ;;  %s354_s30 = sshll.u32 %s2533_s29, 4  ;;  %s2648_s30 = int_to_ptr.vmem [resolvable:$true] %s354_s30 }
  0x16   : > { %s380_s15 = sshll.u32 %s2534_s14, 4  ;;  %s2247_s17 = scalar_lea.vmem %s345_s26, 128  ;;  %s2656_s15 = int_to_ptr.vmem [resolvable:$true] %s380_s15 }
  0x17   : > { %s3307_s28 = scalar_select %p2642_p4, 1, 0 }
  0x18   : > { %p2057_p5 = pneg %p2642_p4  ;;  %p2248_p8 = scmp.ne.s32.totalorder %s345_s26, %s2247_s17 }
  0x19   : > { %p2255_p11 = scmp.lt.s32.totalorder %s345_s26, %s345_s26  ;;  %p2256_p12 = scmp.lt.s32.totalorder %s2247_s17, %s2247_s17 }
  0x1a   : > { %p2652_p6 = pnand %p2057_p5, %p3296_p1 }
  0x1b   : > { %p2257_p13 = por %p2256_p12, %p2255_p11 }
  0x1c   : > { %p2660_p7 = pneg %p2652_p6 }
  0x1e   : > { %p2250_p9 = pnand %p2248_p8, %p2660_p7 }
  0x20   : > { %p2251_p10 = pneg %p2250_p9 }
  0x22   : > { %p2258_p0 = pnand %p2257_p13, %p2251_p10 }
  0x24   : > { %2261 = shalt.err (!%p2258_p0)
}
  0x25   : > { %s3310_s2 = sld [smem:[#allocation26_spill]]  ;;  %s2273_s20 = scalar_lea.vmem %s2648_s30, 2048 }
  0x26   : > { %p2274_p2 = scmp.ne.s32.totalorder %s2648_s30, %s2273_s20  ;;  %p2281_p9 = scmp.lt.s32.totalorder %s2648_s30, %s2648_s30 }
  0x27   : > { %p2282_p11 = scmp.lt.s32.totalorder %s2273_s20, %s2273_s20 }
  0x28   : > { %p2276_p5 = pnand %p2274_p2, %p2660_p7 }
  0x29   : > { %p2283_p10 = por %p2282_p11, %p2281_p9 }
  0x2a   : > { %p2277_p8 = pneg %p2276_p5 }
  0x2b   : > { %2063 = dma.hbm_to_vmem [thread:$0]  (!%p2652_p6), %s3310_s2, 128, %s345_s26, [#allocation7]  }
  0x2c   : > { %p2284_p12 = pnand %p2283_p10, %p2277_p8 }
  0x2e   : > { %2287 = shalt.err (!%p2284_p12)
}
  0x2f   : > { %s2535_s25 = smov 128   ;;  %s2536_s29 = smov 8  }
  0x30   : > { %s3311_s3 = sld [smem:[#allocation27_spill]]  ;;  %s2299_s17 = scalar_lea.vmem %s2656_s15, 2048 }
  0x31   : > { %p2300_p13 = scmp.ne.s32.totalorder %s2656_s15, %s2299_s17  ;;  %p2307_p5 = scmp.lt.s32.totalorder %s2656_s15, %s2656_s15 }
  0x32   : > { %p2308_p8 = scmp.lt.s32.totalorder %s2299_s17, %s2299_s17 }
  0x33   : > { %p2302_p0 = pnand %p2300_p13, %p2660_p7 }
  0x34   : > { %p2309_p9 = por %p2308_p8, %p2307_p5 }
  0x35   : > { %p2303_p2 = pneg %p2302_p0 }
  0x36   : > { %2066 = dma.hbm_to_vmem [thread:$0]  (!%p2652_p6), %s3311_s3, 2048, %s2648_s30, [#allocation10], %s2535_s25, %s2535_s25, %s2536_s29  }
  0x37   : > { %p2310_p11 = pnand %p2309_p9, %p2303_p2 }
  0x39   : > { %2313 = shalt.err (!%p2310_p11)
}
  0x3a   : > { %s3312_s5 = sld [smem:[#allocation29_spill]]  ;;  %s2537_s30 = smov [#allocation3]  }
  0x3b   : > { %s333_s20 = sshll.u32 %s2537_s30, 4  ;;  %s2538_s26 = smov [#allocation11]   ;;  %s334_s20 = int_to_ptr.vmem [resolvable:$true] %s333_s20 }
  0x3c   : > { %s367_s14 = sshll.u32 %s2538_s26, 4  ;;  %s2325_s17 = scalar_lea.vmem %s334_s20, 128  ;;  %s368_s14 = int_to_ptr.vmem [resolvable:$true] %s367_s14 }
  0x3d   : > { %p2326_p10 = scmp.ne.s32.totalorder %s334_s20, %s2325_s17  ;;  %p2333_p0 = scmp.lt.s32.totalorder %s334_s20, %s334_s20 }
  0x3e   : > { %p2334_p2 = scmp.lt.s32.totalorder %s2325_s17, %s2325_s17 }
  0x3f   : > { %p2328_p12 = pnand %p2326_p10, %p2660_p7 }
  0x40   : > { %2072 = dma.hbm_to_vmem [thread:$0]  (!%p2652_p6), %s3312_s5, 2048, %s2656_s15, [#allocation13], %s2535_s25, %s2535_s25, %s2536_s29  }
  0x41   : > { %p2329_p13 = pneg %p2328_p12  ;;  %p2335_p5 = por %p2334_p2, %p2333_p0 }
  0x43   : > { %p2336_p8 = pnand %p2335_p5, %p2329_p13 }
  0x45   : > { %2339 = shalt.err (!%p2336_p8)
}
  0x46   : > { %s3313_s0 = sld [smem:[#allocation25_spill]]  ;;  %s2351_s15 = scalar_lea.vmem %s368_s14, 2048 }
  0x47   : > { %p2352_p9 = scmp.ne.s32.totalorder %s368_s14, %s2351_s15  ;;  %p2359_p10 = scmp.lt.s32.totalorder %s368_s14, %s368_s14 }
  0x48   : > { %p2360_p12 = scmp.lt.s32.totalorder %s2351_s15, %s2351_s15 }
  0x49   : > { %p2354_p11 = pnand %p2352_p9, %p2660_p7 }
  0x4a   : > { %p2361_p1 = por %p2360_p12, %p2359_p10 }
  0x4b   : > { %p2355_p3 = pneg %p2354_p11 }
  0x4c   : > { %2060 = dma.hbm_to_vmem [thread:$0]  (!%p2652_p6), %s3313_s0, 128, %s334_s20, [#allocation4]  }
  0x4d   : > { %p2362_p4 = pnand %p2361_p1, %p2355_p3 }
  0x4f   : > { %2365 = shalt.err (!%p2362_p4)
}
  0x50   : > { %s3314_s4 = sld [smem:[#allocation28_spill]]  ;;  %s2539_s20 = smov [#allocation14]  }
  0x51   : > { %s396_s17 = sshll.u32 %s2539_s20, 4  ;;  %s2540_s18 = smov [#allocation15]   ;;  %s397_s17 = int_to_ptr.vmem [resolvable:$true] %s396_s17 }
  0x52   : > { %s412_s19 = sshll.u32 %s2540_s18, 4  ;;  %s2377_s0 = scalar_lea.vmem %s397_s17, 2048  ;;  %s413_s19 = int_to_ptr.vmem [resolvable:$true] %s412_s19 }
  0x53   : > { %p2378_p13 = scmp.ne.s32.totalorder %s397_s17, %s2377_s0  ;;  %p2385_p4 = scmp.lt.s32.totalorder %s397_s17, %s397_s17 }
  0x54   : > { %p2386_p0 = scmp.lt.s32.totalorder %s2377_s0, %s2377_s0 }
  0x55   : > { %p2380_p1 = pnand %p2378_p13, %p2660_p7 }
  0x56   : > { %2069 = dma.hbm_to_vmem [thread:$0]  (!%p2652_p6), %s3314_s4, 2048, %s368_s14, [#allocation10], %s2535_s25, %s2535_s25, %s2536_s29  }
  0x57   : > { %p2381_p3 = pneg %p2380_p1  ;;  %p2387_p2 = por %p2386_p0, %p2385_p4 }
  0x59   : > { %p2388_p5 = pnand %p2387_p2, %p2381_p3 }
  0x5b   : > { %2391 = shalt.err (!%p2388_p5)
}
  0x5c   : > { %s3315_s7 = sld [smem:[#allocation30_spill]]  ;;  %s2403_s30 = scalar_lea.vmem %s413_s19, 512 }
  0x5d   : > { %p2404_p8 = scmp.ne.s32.totalorder %s413_s19, %s2403_s30  ;;  %p2411_p10 = scmp.lt.s32.totalorder %s413_s19, %s413_s19 }
  0x5e   : > { %p2412_p12 = scmp.lt.s32.totalorder %s2403_s30, %s2403_s30 }
  0x5f   : > { %p2406_p9 = pnand %p2404_p8, %p2660_p7 }
  0x60   : > { %p2413_p13 = por %p2412_p12, %p2411_p10 }
  0x61   : > { %p2407_p11 = pneg %p2406_p9 }
  0x62   : > { %2075 = dma.hbm_to_vmem [thread:$0]  (!%p2652_p6), %s3315_s7, 2048, %s397_s17, [#allocation13], %s2535_s25, %s2535_s25, %s2536_s29  }
  0x63   : > { %p2414_p1 = pnand %p2413_p13, %p2407_p11 }
  0x65   : > { %2417 = shalt.err (!%p2414_p1)
}
  0x66   : > { %s3316_s9 = sld [smem:[#allocation31_spill]]  ;;  %s1871_s13 = sadd.s32 4294967294, %s2530_s24  }
  0x67   : > { %s2740_s16 = sadd.s32 1, %s2530_s24   ;;  %s60_s20 = sadd.s32 1, %s2526_s23 }
  0x68   : > { %s57_s17 = ssub.s32 %s2530_s24, %s2740_s16  ;;  %p67_p7 = scmp.ne.s32.totalorder %s2526_s23, %s2522_s22 }
  0x69   : > { %p58_p3 = scmp.eq.s32.totalorder %s57_s17, 0  ;;  %p68_p4 = scmp.eq.s32.totalorder %s2530_s24, 0 }
  0x6a   : > { %p73_p0 = scmp.ne.s32.totalorder %s2522_s22, %s2518_s21  ;;  %p307_p2 = scmp.eq.s32.totalorder %s2636_s27, 3 }
  0x6b   : > { %s2752_s18 = scalar_select %p58_p3, %s2526_s23, %s60_s20  }
  0x6c   : > { %2078 = dma.hbm_to_vmem [thread:$0]  (!%p2652_p6), %s3316_s9, 512, %s413_s19, [#allocation16], %s2535_s25, %s2535_s25, %s2536_s29  }
  0x6d   : > { %p69_p5 = por %p68_p4, %p67_p7  ;;  %p3317_p8 = scmp.eq.s32.totalorder %s2636_s27, 0 }
  0x6e   : > { %p2760_p6 = por %p307_p2, %p67_p7  ;;  %p313_p11 = scmp.eq.s32.totalorder %s1871_s13, 3 }
  0x6f   : > { %p2756_p9 = por %p3317_p8, %p73_p0  ;;  %p2094_p10 = scmp.lt.s32.totalorder %s2530_s24, 4 }
  0x70   : > { %s3319_s29 = scalar_select %p2760_p6, 1, 0 }
  0x71   : > { %s3318_s25 = scalar_select %p2756_p9, 1, 0 }
  0x72   : > { %s432_s19 = sand.u32 1, %s2530_s24   ;;  %p2766_p12 = por %p313_p11, %p73_p0 }
  0x73   : > { %s434_s15 = sand.u32 1, %s2526_s23   ;;  %s1882_s30 = sshll.u32 %s2530_s24, 7 }
  0x74   : > { %s3320_s14 = scalar_select %p2766_p12, 1, 0 }
  0x75   : > { %s1881_s0 = sshll.u32 %s434_s15, 3  ;;  %s2775_s17 = scalar_lea.hbm %s3284_s1, %s1882_s30 }
  0x76   : > { %p2777_p13 = pnand %p2094_p10, %p69_p5  ;;  %s436_s13 = scalar_lea.vmem [#allocation6], %s1881_s0 }
  0x77   : > { %s443_s3 = sshll.u32 %s436_s13, 4  ;;  %s433_s4 = scalar_lea.sflag [#allocation7], %s432_s19  ;;  %s444_s3 = int_to_ptr.vmem [resolvable:$true] %s443_s3 }
  0x78   : > { %s2418_s5 = scalar_lea.hbm %s2775_s17, 128  ;;  %p2420_p7 = pneg %p2777_p13 }
  0x79   : > { %p2419_p1 = scmp.ne.s32.totalorder %s2775_s17, %s2418_s5  ;;  %s2423_s26 = scalar_lea.hbm %s3284_s1, 512 }
  0x7a   : > { %p2424_p0 = scmp.lt.s32.totalorder %s2775_s17, %s3284_s1  ;;  %p2425_p2 = scmp.lt.s32.totalorder %s2423_s26, %s2418_s5 }
  0x7b   : > { %p2421_p3 = pnand %p2420_p7, %p2419_p1 }
  0x7c   : > { %p2426_p5 = por %p2425_p2, %p2424_p0 }
  0x7d   : > { %p2422_p4 = pneg %p2421_p3 }
  0x7f   : > { %p2427_p8 = pnand %p2426_p5, %p2422_p4 }
  0x81   : > { %2430 = shalt.err (!%p2427_p8)
}
  0x82   : > { %s2431_s0 = scalar_lea.vmem %s444_s3, 128  ;;  %s2541_s19 = smov [#allocation6]  }
  0x83   : > { %p2432_p11 = scmp.ne.s32.totalorder %s444_s3, %s2431_s0  ;;  %s2436_s13 = sshll.u32 %s2541_s19, 4  ;;  %s2437_s13 = int_to_ptr.vmem [resolvable:$false] %s2436_s13 }
  0x84   : > { %s2438_s9 = scalar_lea.vmem %s2437_s13, 256  ;;  %p2439_p1 = scmp.lt.s32.totalorder %s444_s3, %s2437_s13 }
  0x85   : > { %p2434_p10 = pnand %p2432_p11, %p2420_p7  ;;  %p2440_p3 = scmp.lt.s32.totalorder %s2438_s9, %s2431_s0 }
  0x87   : > { %p2435_p12 = pneg %p2434_p10  ;;  %p2441_p6 = por %p2440_p3, %p2439_p1 }
  0x89   : > { %p2442_p9 = pnand %p2441_p6, %p2435_p12 }
  0x8b   : > { %2445 = shalt.err (!%p2442_p9)
}
  0x8c   : > { %2082 = dma.hbm_to_vmem [thread:$0]  (!%p2777_p13), %s2775_s17, 128, %s444_s3, %s433_s4  }
  0x8d   : > { %p3322_p4 = scmp.ne.s32.totalorder %s3307_s28, 0 }
  0x8e   : > { %p3323_p0 = scmp.eq.s32.totalorder (!%p3322_p4), %s2636_s27, 0 }
  0x8f   : > { %452 = sbr.rel (%p3322_p4) target bundleno = 2776 (0xad8), region = 68 }
  0x94   : > { %2489 = dma.done.wait (%p3323_p0), [#allocation4], 128   ;;  %p3324_p7 = pmov %p3323_p0 }
  0x95   : > { %s458_s5 = sand.u32 1, %s2636_s27   ;;  %s460_s7 = sand.u32 1, %s2522_s22  }
  0x96   : > { %2491 = vsyncadd (%p3324_p7), [#allocation4], 4294967168  ;;  %s2805_s9 = sshll.u32 %s460_s7, 3  ;;  %s459_s2 = scalar_lea.sflag [#allocation7], %s458_s5 }
  0x97   : > { %s462_s3 = scalar_lea.vmem [#allocation6], %s2805_s9  ;;  %p3325_p9 = scmp.ne.s32.totalorder %s3318_s25, 0 }
  0x99   : > { %2493 = dma.done.wait (%p3325_p9), %s459_s2, 128  }
  0x9a   : > { %2495 = vsyncadd (%p3325_p9), %s459_s2, 4294967168  ;;  %p3326_p6 = pmov %p3323_p0 }
  0x9b   : > { %p3327_p12 = pmov %p3323_p0 }
  0x9c   : > { %2497 = dma.done.wait (%p3326_p6), [#allocation7], 128  }
  0x9d   : > { %2499 = vsyncadd (%p3327_p12), [#allocation7], 4294967168  ;;  %p3328_p13 = pmov %p3323_p0 }
  0x9e   : > { %p3329_p2 = pmov %p3323_p0 }
  0x9f   : > { %2501 = dma.done.wait (%p3328_p13), [#allocation10], 4096  }
  0xa0   : > { %2503 = vsyncadd (%p3329_p2), [#allocation10], 4294963200  ;;  %p3330_p5 = pmov %p3323_p0 }
  0xa1   : > { %p3331_p8 = pmov %p3323_p0 }
  0xa2   : > { %2505 = dma.done.wait (%p3330_p5), [#allocation13], 4096  }
  0xa3   : > { %2507 = vsyncadd (%p3331_p8), [#allocation13], 4294963200  ;;  %p3332_p11 = pmov %p3323_p0 }
  0xa4   : > { %p3333_p10 = pmov %p3323_p0 }
  0xa5   : > { %2509 = dma.done.wait (%p3332_p11), [#allocation16], 512  }
  0xa6   : > { %2511 = vsyncadd (%p3333_p10), [#allocation16], 4294966784  ;;  %s526_s4 = scalar_lea.vmem [#allocation17], %s2805_s9  ;;  %p3334_p1 = scmp.ne.s32.totalorder %s2636_s27, 0 }
  0xa8   : > { %530 = sbr.rel (%p3334_p1) target bundleno = 175 (0xaf), region = 104 }
  0xad   : > { %v531_v0 = vld [vmem:[#allocation3] sm:$0xff] }
  0xae   : > { %532 = vst [vmem:[#allocation2] sm:$0xff] %v531_v0 }
  0xaf PF: > { %v535_v2 = vld [vmem:[%s462_s3] sm:$0xff]  ;;  %s2542_s28 = smov 96   ;;  %v2543_v3 = vmov 0.0   ;;  %v569_v4 = vld [vmem:[#allocation12 + $0x78] sm:$0xff]  ;;  %s2544_s25 = smov 64   ;;  %vm2545_vm0 = vmmov 0   ;;  %v778_v51 = vlaneseq }
  0xb0   : > { %1944 = vmatprep.subr.mxu0 %v2543_v3  ;;  %v568_v5 = vld [vmem:[#allocation12 + $0x70] sm:$0xff]  ;;  %v534_v6 = vld [vmem:[#allocation8] sm:$0xff]  ;;  %545 = vrot.lane.b32.xlu1 %v535_v2, %s2544_s25  ;;  %v567_v7 = vld [vmem:[#allocation12 + $0x68] sm:$0xff]  ;;  %s2546_s17 = smov 32   ;;  %vm548_vm1 = vcmask 261120   ;;  %vm550_vm2 = vcmask 523264  }
  0xb1   : > { %1945 = vmatpush3.msra.mxu0 %v569_v4  ;;  %1976 = vmatprep.mubr.msk.f32.mxu0 %vm2545_vm0, %v2543_v3  ;;  %v566_v8 = vld [vmem:[#allocation12 + $0x60] sm:$0xff]  ;;  %v565_v9 = vld [vmem:[#allocation12 + $0x58] sm:$0xff]  ;;  %v564_v10 = vld [vmem:[#allocation12 + $0x50] sm:$0xff]  ;;  %vm552_vm3 = vcmask 785408   ;;  %v2547_v49 = vmov 1966171168  }
  0xb2   : > { %1946 = vmatprep.subr.mxu0 %v2543_v3  ;;  %1979 = vmatprep.subr.mxu1 %v2543_v3  ;;  %v563_v11 = vld [vmem:[#allocation12 + $0x48] sm:$0xff]  ;;  %v562_v12 = vld [vmem:[#allocation12 + $0x40] sm:$0xff]  ;;  %v561_v13 = vld [vmem:[#allocation12 + $0x38] sm:$0xff]  ;;  %v776_v50 = vunpack.c.l.s4 %v2547_v49  ;;  %v2882_v53 = vshrl.u32 %v778_v51, 7  ;;  %vm993_vm4 = vcmask 130112   ;;  %vm1058_vm5 = vcmask 1041409  }
  0xb3   : > { %1947 = vmatpush3.msra.mxu0 %v568_v5  ;;  %1987 = vmatprep.mubr.msk.f32.mxu1 %vm2545_vm0, %v2543_v3  ;;  %v560_v14 = vld [vmem:[#allocation12 + $0x30] sm:$0xff]  ;;  %v559_v15 = vld [vmem:[#allocation12 + $0x28] sm:$0xff]  ;;  %v558_v16 = vld [vmem:[#allocation12 + $0x20] sm:$0xff]  ;;  %vm1060_vm6 = vcmask 1042434   ;;  %vm1062_vm7 = vcmask 1043459   ;;  %vm1064_vm8 = vcmask 1044484  }
  0xb4   : > { %1948 = vmatprep.subr.mxu0 %v2543_v3  ;;  %v557_v17 = vld [vmem:[#allocation12 + $0x18] sm:$0xff]  ;;  %v556_v18 = vld [vmem:[#allocation12 + $0x10] sm:$0xff]  ;;  %v555_v19 = vld [vmem:[#allocation12 + $0x8] sm:$0xff]  ;;  %v777_v52 = vunpack.c.0.s8 %v776_v50  ;;  %v2889_v61 = vsub.s32 0, %v2882_v53  ;;  %vm1066_vm9 = vcmask 1045509   ;;  %vm1068_vm10 = vcmask 1046534  }
  0xb5   : > { %v533_v1 = vld [vmem:[#allocation2] sm:$0xff]  ;;  %1949 = vmatpush3.msra.mxu0 %v567_v7  ;;  %v554_v20 = vld [vmem:[#allocation12] sm:$0xff]  ;;  %v673_v42 = vld [vmem:[#allocation15 + $0x10] sm:$0xff]  ;;  %vm1070_vm11 = vcmask 1047559   ;;  %vm1073_vm12 = vcmask 130048   ;;  %s1902_s2 = sshll.u32 %s2636_s27, 7 }
  0xb6   : > { %537 = vrot.lane.b32.xlu0 %v533_v1, %s2542_s28  ;;  %1950 = vmatprep.subr.mxu0 %v2543_v3  ;;  %v1894_v27 = vld [vmem:[%s3289_s6] ss:$0 sm:$0xff]  ;;  %v672_v43 = vld [vmem:[#allocation15 + $0x8] sm:$0xff]  ;;  %v671_v44 = vld [vmem:[#allocation15] sm:$0xff]  ;;  %v780_v55 = vsub.s32 %v777_v52, %v2882_v53  ;;  %s1732_s3 = sshll.u32 %s526_s4, 4  ;;  %s3237_s30 = scalar_lea.hbm %s3295_s12, %s1902_s2  ;;  %s3239_s3 = int_to_ptr.vmem [resolvable:$true] %s1732_s3 }
  0xb7   : > { %1951 = vmatpush3.msra.mxu0 %v566_v8  ;;  %v674_v41 = vld [vmem:[#allocation15 + $0x18] sm:$0xff]  ;;  %v757_v4 = vld [vmem:[#allocation11] sm:$0xff]  ;;  %v759_v8 = vld [vmem:[#allocation11 + $0x10] sm:$0xff]  ;;  %s1719_s27 = scalar_lea.sflag [#allocation5], %s460_s7  ;;  %p3335_p4 = scmp.ne.s32.totalorder %s3319_s29, 0 }
  0xb8   : > { %1952 = vmatprep.subr.mxu0 %v2543_v3  ;;  %1980 = vmatpush3.msra.mxu1 %v674_v41  ;;  %v1896_v54 = vld [vmem:[%s3293_s10] ss:$0 sm:$0xff] }
  0xb9   : > { %1953 = vmatpush3.msra.mxu0 %v565_v9  ;;  %1981 = vmatprep.subr.mxu1 %v2543_v3  ;;  %v760_v9 = vld [vmem:[#allocation11 + $0x18] sm:$0xff] }
  0xba   : > { %541 = vrot.lane.b32.xlu0 %v534_v6, %s2546_s17  ;;  %1954 = vmatprep.subr.mxu0 %v2543_v3  ;;  %v758_v6 = vld [vmem:[#allocation11 + $0x8] sm:$0xff] }
  0xbb   : > { %1955 = vmatpush3.msra.mxu0 %v564_v10  ;;  %1982 = vmatpush3.msra.mxu1 %v673_v42 }
  0xbc   : > { %1956 = vmatprep.subr.mxu0 %v2543_v3  ;;  %1983 = vmatprep.subr.mxu1 %v2543_v3 }
  0xbd   : > { %1957 = vmatpush3.msra.mxu0 %v563_v11  ;;  %1984 = vmatpush3.msra.mxu1 %v672_v43  ;;  %v769_v43 = vld [vmem:[#allocation11 + $0x60] sm:$0xff] }
  0xbe   : > { %1958 = vmatprep.subr.mxu0 %v2543_v3  ;;  %1985 = vmatprep.subr.mxu1 %v2543_v3 }
  0xbf   : > { %1959 = vmatpush3.msra.mxu0 %v562_v12  ;;  %1986 = vmatpush3.msra.mxu1 %v671_v44  ;;  %v770_v44 = vld [vmem:[#allocation11 + $0x68] sm:$0xff] }
  0xc0   : > { %1960 = vmatprep.subr.mxu0 %v2543_v3  ;;  %1990 = vmatprep.subr.mxu1 %v2543_v3 }
  0xc1   : > { %1961 = vmatpush3.msra.mxu0 %v561_v13  ;;  %v761_v13 = vld [vmem:[#allocation11 + $0x20] sm:$0xff] }
  0xc2   : > { %1962 = vmatprep.subr.mxu0 %v2543_v3 }
  0xc3   : > { %1963 = vmatpush3.msra.mxu0 %v560_v14 }
  0xc4   : > { %1964 = vmatprep.subr.mxu0 %v2543_v3 }
  0xc5   : > { %1965 = vmatpush3.msra.mxu0 %v559_v15  ;;  %v762_v15 = vld [vmem:[#allocation11 + $0x28] sm:$0xff] }
  0xc6   : > { %1966 = vmatprep.subr.mxu0 %v2543_v3 }
  0xc7   : > { %1967 = vmatpush3.msra.mxu0 %v558_v16 }
  0xc8   : > { %1968 = vmatprep.subr.mxu0 %v2543_v3 }
  0xc9   : > { %1969 = vmatpush3.msra.mxu0 %v557_v17 }
  0xca   : > { %1970 = vmatprep.subr.mxu0 %v2543_v3 }
  0xcb   : > { %1971 = vmatpush3.msra.mxu0 %v556_v18 }
  0xcc   : > { %1972 = vmatprep.subr.mxu0 %v2543_v3 }
  0xcd   : > { %1973 = vmatpush3.msra.mxu0 %v555_v19 }
  0xce   : > { %1974 = vmatprep.subr.mxu0 %v2543_v3 }
  0xcf   : > { %1975 = vmatpush3.msra.mxu0 %v554_v20 }
 0x122   : > { %v546_v22 = vpop.permute.xlu1 %545 }
 0x128   : > { %v538_v21 = vpop.permute.xlu0 %537 }
 0x12c   : > { %v542_v23 = vpop.permute.xlu0 %541 }
 0x12d   : > { %v549_v24 = vsel %vm548_vm1, %v538_v21, %v542_v23 }
 0x12e   : > { %v551_v25 = vsel %vm550_vm2, %v549_v24, %v546_v22  ;;  %v765_v22 = vld [vmem:[#allocation11 + $0x40] sm:$0xff]  ;;  %v766_v24 = vld [vmem:[#allocation11 + $0x48] sm:$0xff] }
 0x12f   : > { %v553_v26 = vsel %vm552_vm3, %v551_v25, %v538_v21 }
 0x130   : > { %1977 = vmatmul.mubr.f32.vlgmr.msra.gmra.mxu0 %v553_v26 }
 0x1f0   : > { %v643_v28 = vpop.f32.mrf.mxu0 }
 0x1f1   : > { %v644_v29 = vadd.f32 %v1894_v27, %v643_v28  ;;  %v764_v28 = vld [vmem:[#allocation11 + $0x38] sm:$0xff] }
 0x1f2   : > { %v1978_v30 = vpop.f32.mrf.mxu0 }
 0x1f3   : > { %2153 = vtanh.f32 %v644_v29  ;;  %v1895_v32 = vmul.f32 -1.442695, %v644_v29  ;;  %v763_v30 = vld [vmem:[#allocation11 + $0x30] sm:$0xff] }
 0x1f5   : > { %2155 = vpow2.f32 %v1895_v32 }
 0x200   : > { %v2154_v31 = vpop.eup %2153 }
 0x201   : > { %656 = vrot.lane.b32.xlu1 %v2154_v31, %s2546_s17 }
 0x202   : > { %v2156_v33 = vpop.eup %2155 }
 0x203   : > { %v650_v34 = vadd.f32 1.0, %v2156_v33 }
 0x205   : > { %2157 = vrcp.f32 %v650_v34  ;;  %v768_v34 = vld [vmem:[#allocation11 + $0x58] sm:$0xff] }
 0x212   : > { %v2158_v35 = vpop.eup %2157 }
 0x213   : > { %v654_v38 = vmul.f32 %v2158_v35, %v538_v21 }
 0x273   : > { %v657_v36 = vpop.permute.xlu1 %656 }
 0x274   : > { %v659_v37 = vmul.f32 %v2158_v35, %v657_v36  ;;  %v767_v36 = vld [vmem:[#allocation11 + $0x50] sm:$0xff] }
 0x276   : > { %661 = vrot.lane.b32.xlu0 %v659_v37, %s2546_s17 }
 0x2e8   : > { %v662_v39 = vpop.permute.xlu0 %661 }
 0x2e9   : > { %v2863_v40 = vadd.f32 %v662_v39, %v654_v38  ;;  %v2900_v38 = vld [vmem:[%s3294_s11] ss:$0 sm:$0xff] }
 0x2eb   : > { %2159 = vtanh.f32 %v2863_v40 }
 0x2f8   : > { %v2160_v45 = vpop.eup %2159 }
 0x2f9   : > { %667 = vrot.lane.b32.xlu1 %v2160_v45, %s2546_s17 }
 0x36b   : > { %v668_v46 = vpop.permute.xlu1 %667 }
 0x36c   : > { %v2871_v47 = vmul.f32 %v2158_v35, %v668_v46 }
 0x36e   : > { %683 = vrot.lane.b32.xlu0 %v2871_v47, %s2544_s25 }
 0x3e0   : > { %v2875_v48 = vpop.permute.xlu0 %683 }
 0x3e1   : > { %1988 = vmatmul.mubr.msk.f32.vlgmr.msra.gmra.mxu1 %vm548_vm1, %v2875_v48 }
 0x3e2   : > { %2022 = vmatprep.mubr.msk.f32.mxu1 %vm2545_vm0, %v2543_v3 }
 0x4a1   : > { %v753_v56 = vpop.f32.mrf.mxu1 }
 0x4a2   : > { %v754_v57 = vadd.f32 %v1896_v54, %v753_v56 }
 0x4a3   : > { %v1989_v58 = vpop.f32.mrf.mxu1 }
 0x4a4   : > { %v774_v59 = vcombine.high %v754_v57, %v754_v57  ;;  %v781_v60 = vrot.slane %v754_v57, %v780_v55 }
 0x4a6   : > { %v789_v62 = vcombine.high %v781_v60, %v781_v60  ;;  %v797_v63 = vrot.slane %v781_v60, %v780_v55  ;;  %v788_v0 = vrot.slane %v774_v59, %v780_v55  ;;  %v772_v60 = vld [vmem:[#allocation11 + $0x78] sm:$0xff] }
 0x4a8   : > { %v811_v1 = vrot.slane %v789_v62, %v780_v55  ;;  %v819_v2 = vcombine.high %v797_v63, %v797_v63  ;;  %v826_v5 = vrot.slane %v797_v63, %v2889_v61  ;;  %v804_v10 = vrot.slane %v788_v0, %v780_v55 }
 0x4a9   : > { %v790_v17 = vcombine.high %v788_v0, %v788_v0 }
 0x4aa   : > { %v830_v7 = vrot.slane %v811_v1, %v2889_v61  ;;  %v834_v11 = vrot.slane %v819_v2, %v2889_v61  ;;  %v863_v12 = vadd.f32 %v826_v5, %v757_v4  ;;  %v864_v14 = vadd.f32 %v826_v5, %v758_v6  ;;  %v771_v2 = vld [vmem:[#allocation11 + $0x70] sm:$0xff] }
 0x4ab   : > { %v821_v19 = vcombine.high %v811_v1, %v811_v1  ;;  %v842_v20 = vrot.slane %v804_v10, %v2889_v61  ;;  %v818_v25 = vrot.slane %v790_v17, %v780_v55  ;;  %v820_v31 = vcombine.high %v804_v10, %v804_v10 }
 0x4ac   : > { %v865_v16 = vadd.f32 %v830_v7, %v759_v8  ;;  %v866_v18 = vadd.f32 %v830_v7, %v760_v9  ;;  %v867_v21 = vadd.f32 %v834_v11, %v761_v13  ;;  %2161 = vtanh.f32 %v863_v12 }
 0x4ad   : > { %v868_v23 = vadd.f32 %v834_v11, %v762_v15  ;;  %2163 = vtanh.f32 %v864_v14  ;;  %v838_v26 = vrot.slane %v821_v19, %v2889_v61  ;;  %v871_v27 = vadd.f32 %v842_v20, %v765_v22 }
 0x4ae   : > { %2165 = vtanh.f32 %v865_v16  ;;  %v872_v29 = vadd.f32 %v842_v20, %v766_v24  ;;  %v846_v32 = vrot.slane %v818_v25, %v2889_v61  ;;  %v822_v37 = vcombine.high %v818_v25, %v818_v25 }
 0x4af   : > { %2167 = vtanh.f32 %v866_v18  ;;  %v870_v33 = vadd.f32 %v838_v26, %v764_v28  ;;  %v869_v35 = vadd.f32 %v838_v26, %v763_v30  ;;  %v850_v39 = vrot.slane %v820_v31, %v2889_v61 }
 0x4b0   : > { %2169 = vtanh.f32 %v867_v21  ;;  %v874_v41 = vadd.f32 %v846_v32, %v768_v34  ;;  %v873_v45 = vadd.f32 %v846_v32, %v767_v36  ;;  %v854_v52 = vrot.slane %v822_v37, %v2889_v61 }
 0x4b1   : > { %2171 = vtanh.f32 %v868_v23  ;;  %v875_v56 = vadd.f32 %v850_v39, %v769_v43  ;;  %v876_v57 = vadd.f32 %v850_v39, %v770_v44 }
 0x4b2   : > { %2173 = vtanh.f32 %v871_v27  ;;  %v878_v4 = vadd.f32 %v854_v52, %v772_v60  ;;  %v877_v8 = vadd.f32 %v854_v52, %v771_v2 }
 0x4b3   : > { %2175 = vtanh.f32 %v872_v29 }
 0x4b4   : > { %2177 = vtanh.f32 %v870_v33 }
 0x4b5   : > { %2179 = vtanh.f32 %v869_v35 }
 0x4b6   : > { %2181 = vtanh.f32 %v874_v41 }
 0x4b7   : > { %2183 = vtanh.f32 %v873_v45 }
 0x4b8   : > { %2185 = vtanh.f32 %v876_v57 }
 0x4b9   : > { %v2162_v42 = vpop.eup %2161  ;;  %2187 = vtanh.f32 %v875_v56 }
 0x4ba   : > { %v2164_v46 = vpop.eup %2163  ;;  %v902_v49 = vmul.f32 %v2162_v42, %v2900_v38  ;;  %2189 = vtanh.f32 %v878_v4 }
 0x4bb   : > { %v2166_v50 = vpop.eup %2165  ;;  %v903_v54 = vmul.f32 %v2164_v46, %v2900_v38  ;;  %2191 = vtanh.f32 %v877_v8 }
 0x4bc   : > { %v2168_v55 = vpop.eup %2167  ;;  %v918_v58 = vsel %vm548_vm1, %v902_v49, 0.0  ;;  %v904_v0 = vmul.f32 %v2166_v50, %v2900_v38  ;;  %v983_v50 = vand.u32 127, %v778_v51 }
 0x4bd   : > { %v2170_v59 = vpop.eup %2169  ;;  %v921_v62 = vsel %vm548_vm1, %v903_v54, 0.0  ;;  %919 = vadd.xlane.f32.xlu1 %v918_v58  ;;  %v905_v63 = vmul.f32 %v2168_v55, %v2900_v38 }
 0x4be   : > { %v2172_v1 = vpop.eup %2171  ;;  %922 = vadd.xlane.f32.xlu0 %v921_v62  ;;  %v924_v9 = vsel %vm548_vm1, %v904_v0, 0.0  ;;  %v906_v10 = vmul.f32 %v2170_v59, %v2900_v38  ;;  %v988_v54 = vadd.s32 4294967288, %v983_v50  ;;  %v2954_v57 = vsub.s32 %v983_v50, %v2882_v53 }
 0x4bf   : > { %v927_v5 = vsel %vm548_vm1, %v905_v63, 0.0  ;;  %v907_v6 = vmul.f32 %v2172_v1, %v2900_v38  ;;  %v2174_v7 = vpop.eup %2173 }
 0x4c0   : > { %v2176_v11 = vpop.eup %2175  ;;  %v930_v15 = vsel %vm548_vm1, %v906_v10, 0.0  ;;  %v910_v16 = vmul.f32 %v2174_v7, %v2900_v38  ;;  %v2957_v58 = vsub.s32 %v988_v54, %v2882_v53 }
 0x4c1   : > { %928 = vadd.xlane.f32.xlu1 %v927_v5  ;;  %v933_v12 = vsel %vm548_vm1, %v907_v6, 0.0  ;;  %v911_v13 = vmul.f32 %v2176_v11, %v2900_v38  ;;  %v2178_v14 = vpop.eup %2177 }
 0x4c2   : > { %925 = vadd.xlane.f32.xlu0 %v924_v9  ;;  %v2180_v17 = vpop.eup %2179  ;;  %v909_v19 = vmul.f32 %v2178_v14, %v2900_v38  ;;  %v942_v21 = vsel %vm548_vm1, %v910_v16, 0.0 }
 0x4c3   : > { %v945_v18 = vsel %vm548_vm1, %v911_v13, 0.0  ;;  %v2182_v20 = vpop.eup %2181  ;;  %v908_v22 = vmul.f32 %v2180_v17, %v2900_v38 }
 0x4c4   : > { %v2184_v23 = vpop.eup %2183  ;;  %v939_v24 = vsel %vm548_vm1, %v909_v19, 0.0  ;;  %v913_v25 = vmul.f32 %v2182_v20, %v2900_v38 }
 0x4c5   : > { %934 = vadd.xlane.f32.xlu1 %v933_v12  ;;  %v2186_v26 = vpop.eup %2185  ;;  %v936_v27 = vsel %vm548_vm1, %v908_v22, 0.0  ;;  %v912_v28 = vmul.f32 %v2184_v23, %v2900_v38 }
 0x4c6   : > { %931 = vadd.xlane.f32.xlu0 %v930_v15  ;;  %v2188_v29 = vpop.eup %2187  ;;  %v951_v30 = vsel %vm548_vm1, %v913_v25, 0.0  ;;  %v915_v31 = vmul.f32 %v2186_v26, %v2900_v38 }
 0x4c7   : > { %v2190_v32 = vpop.eup %2189  ;;  %v948_v33 = vsel %vm548_vm1, %v912_v28, 0.0  ;;  %v914_v34 = vmul.f32 %v2188_v29, %v2900_v38 }
 0x4c8   : > { %v2192_v35 = vpop.eup %2191  ;;  %v957_v36 = vsel %vm548_vm1, %v915_v31, 0.0  ;;  %v917_v37 = vmul.f32 %v2190_v32, %v2900_v38 }
 0x4c9   : > { %946 = vadd.xlane.f32.xlu1 %v945_v18  ;;  %v954_v39 = vsel %vm548_vm1, %v914_v34, 0.0  ;;  %v916_v41 = vmul.f32 %v2192_v35, %v2900_v38 }
 0x4ca   : > { %943 = vadd.xlane.f32.xlu0 %v942_v21  ;;  %v963_v42 = vsel %vm548_vm1, %v917_v37, 0.0  ;;  %v1084_v37 = vsub.s32 1, %v2882_v53 }
 0x4cb   : > { %v960_v43 = vsel %vm548_vm1, %v916_v41, 0.0 }
 0x4cd   : > { %940 = vadd.xlane.f32.xlu1 %v939_v24 }
 0x4ce   : > { %937 = vadd.xlane.f32.xlu0 %v936_v27 }
 0x4d1   : > { %952 = vadd.xlane.f32.xlu1 %v951_v30 }
 0x4d2   : > { %949 = vadd.xlane.f32.xlu0 %v948_v33 }
 0x4d5   : > { %958 = vadd.xlane.f32.xlu1 %v957_v36  ;;  %v2548_v36 = vmov 0  }
 0x4d6   : > { %955 = vadd.xlane.f32.xlu0 %v954_v39  ;;  %2151 = vset.pattern.permute.xlu1 %v2548_v36 }
 0x4d7   : > { %2152 = vset.pattern.permute.xlu0 %v2548_v36 }
 0x4d9   : > { %964 = vadd.xlane.f32.xlu1 %v963_v42 }
 0x4da   : > { %961 = vadd.xlane.f32.xlu0 %v960_v43  ;;  %v1100_v43 = vsub.s32 5, %v2882_v53 }
 0x546   : > { %v2936_v44 = vpop.xlane.xlu1 %919 }
 0x547   : > { %v2938_v45 = vpop.xlane.xlu0 %922  ;;  %v987_v2 = vrot.slane %v2936_v44, %v2954_v57 }
 0x548   : > { %v992_v1 = vrot.slane %v2938_v45, %v2957_v58 }
 0x54a   : > { %v2940_v46 = vpop.xlane.xlu1 %928  ;;  %v994_v10 = vsel %vm993_vm4, %v992_v1, %v987_v2 }
 0x54b   : > { %v2942_v49 = vpop.xlane.xlu0 %925  ;;  %v1002_v51 = vrot.slane %v2940_v46, %v2957_v58 }
 0x54c   : > { %v998_v62 = vrot.slane %v2942_v49, %v2954_v57 }
 0x54e   : > { %v2945_v52 = vpop.xlane.xlu1 %934  ;;  %v1003_v8 = vsel %vm993_vm4, %v1002_v51, %v998_v62  ;;  %v1088_v51 = vsub.s32 2, %v2882_v53 }
 0x54f   : > { %v2947_v38 = vpop.xlane.xlu0 %931  ;;  %v1011_v63 = vrot.slane %v2945_v52, %v2957_v58  ;;  %v1059_v15 = vsel %vm1058_vm5, %v1003_v8, %v994_v10 }
 0x550   : > { %v1007_v0 = vrot.slane %v2947_v38, %v2954_v57 }
 0x552   : > { %v2949_v55 = vpop.xlane.xlu1 %946  ;;  %v1012_v9 = vsel %vm993_vm4, %v1011_v63, %v1007_v0  ;;  %v1104_v63 = vsub.s32 6, %v2882_v53 }
 0x553   : > { %v2951_v56 = vpop.xlane.xlu0 %943  ;;  %v1029_v16 = vrot.slane %v2949_v55, %v2957_v58  ;;  %v1061_v20 = vsel %vm1060_vm6, %v1012_v9, %v1059_v15  ;;  %v1092_v9 = vsub.s32 3, %v2882_v53 }
 0x554   : > { %v1025_v17 = vrot.slane %v2951_v56, %v2954_v57 }
 0x556   : > { %v2959_v59 = vpop.xlane.xlu1 %940  ;;  %v1030_v25 = vsel %vm993_vm4, %v1029_v16, %v1025_v17 }
 0x557   : > { %v2961_v60 = vpop.xlane.xlu0 %937  ;;  %v1020_v4 = vrot.slane %v2959_v59, %v2957_v58 }
 0x558   : > { %v1016_v5 = vrot.slane %v2961_v60, %v2954_v57 }
 0x55a   : > { %v2979_v6 = vpop.xlane.xlu1 %952  ;;  %v1021_v11 = vsel %vm993_vm4, %v1020_v4, %v1016_v5 }
 0x55b   : > { %v2981_v7 = vpop.xlane.xlu0 %949  ;;  %v1038_v12 = vrot.slane %v2979_v6, %v2957_v58  ;;  %v1063_v22 = vsel %vm1062_vm7, %v1021_v11, %v1061_v20  ;;  %v1096_v20 = vsub.s32 4, %v2882_v53 }
 0x55c   : > { %v1034_v13 = vrot.slane %v2981_v7, %v2954_v57  ;;  %v1065_v30 = vsel %vm1064_vm8, %v1030_v25, %v1063_v22 }
 0x55e   : > { %v2991_v14 = vpop.xlane.xlu1 %958  ;;  %v1039_v23 = vsel %vm993_vm4, %v1038_v12, %v1034_v13 }
 0x55f   : > { %v1047_v18 = vrot.slane %v2991_v14, %v2957_v58  ;;  %v956_v19 = vpop.xlane.xlu0 %955  ;;  %v1067_v31 = vsel %vm1066_vm9, %v1039_v23, %v1065_v30 }
 0x560   : > { %v1043_v21 = vrot.slane %v956_v19, %v2954_v57 }
 0x562   : > { %v3004_v24 = vpop.xlane.xlu1 %964  ;;  %v1048_v28 = vsel %vm993_vm4, %v1047_v18, %v1043_v21 }
 0x563   : > { %v1056_v26 = vrot.slane %v3004_v24, %v2957_v58  ;;  %v962_v27 = vpop.xlane.xlu0 %961  ;;  %v1069_v33 = vsel %vm1068_vm10, %v1048_v28, %v1067_v31 }
 0x564   : > { %v1052_v29 = vrot.slane %v962_v27, %v2954_v57 }
 0x566   : > { %v1057_v32 = vsel %vm993_vm4, %v1056_v26, %v1052_v29 }
 0x567   : > { %v1071_v34 = vsel %vm1070_vm11, %v1057_v32, %v1069_v33 }
 0x568   : > { %v1074_v35 = vsel %vm1073_vm12, %v1071_v34, -inf }
 0x569   : > { %1075 = vmax.xlane.f32.xlu0 %v1074_v35 }
 0x5f2   : > { %v1076_v39 = vpop.xlane.xlu0 %1075 }
 0x5f3   : > { %v1081_v41 = vrot.slane %v1076_v39, %v2889_v61  ;;  %v1085_v42 = vrot.slane %v1076_v39, %v1084_v37  ;;  %v3029_v0 = vrot.slane %v1076_v39, %v1100_v43  ;;  %v1089_v4 = vrot.slane %v1076_v39, %v1088_v51 }
 0x5f4   : > { %v1093_v15 = vrot.slane %v1076_v39, %v1092_v9 }
 0x5f5   : > { %v1118_v50 = vsub.f32 %v2936_v44, %v1081_v41  ;;  %v1119_v54 = vsub.f32 %v2938_v45, %v1081_v41  ;;  %v1120_v62 = vsub.f32 %v2942_v49, %v1085_v42  ;;  %v1121_v5 = vsub.f32 %v2940_v46, %v1085_v42 }
 0x5f6   : > { %v1108_v45 = vsub.s32 7, %v2882_v53  ;;  %v1105_v49 = vrot.slane %v1076_v39, %v1104_v63  ;;  %v1128_v8 = vsub.f32 %v2981_v7, %v3029_v0  ;;  %v1122_v10 = vsub.f32 %v2947_v38, %v1089_v4  ;;  %v3172_v53 = vld [vmem:[#allocation2] sm:$0xff] }
 0x5f7   : > { %v1134_v1 = vmul.f32 1.442695, %v1118_v50  ;;  %v1136_v2 = vmul.f32 1.442695, %v1119_v54  ;;  %v1138_v44 = vmul.f32 1.442695, %v1120_v62  ;;  %v1123_v16 = vsub.f32 %v2945_v52, %v1089_v4 }
 0x5f8   : > { %v1140_v11 = vmul.f32 1.442695, %v1121_v5  ;;  %v1109_v46 = vrot.slane %v1076_v39, %v1108_v45  ;;  %v1130_v12 = vsub.f32 %v956_v19, %v1105_v49  ;;  %v1154_v13 = vmul.f32 1.442695, %v1128_v8 }
 0x5f9   : > { %2193 = vpow2.f32 %v1134_v1  ;;  %v1142_v17 = vmul.f32 1.442695, %v1122_v10  ;;  %v1124_v38 = vsub.f32 %v2961_v60, %v1093_v15  ;;  %v1144_v21 = vmul.f32 1.442695, %v1123_v16 }
 0x5fa   : > { %2195 = vpow2.f32 %v1136_v2  ;;  %v1132_v18 = vsub.f32 %v962_v27, %v1109_v46  ;;  %v1158_v7 = vmul.f32 1.442695, %v1130_v12  ;;  %v1097_v52 = vrot.slane %v1076_v39, %v1096_v20 }
 0x5fb   : > { %2197 = vpow2.f32 %v1138_v44  ;;  %v1125_v25 = vsub.f32 %v2959_v59, %v1093_v15  ;;  %v1146_v26 = vmul.f32 1.442695, %v1124_v38  ;;  %v1131_v36 = vsub.f32 %v2991_v14, %v1105_v49 }
 0x5fc   : > { %2199 = vpow2.f32 %v1140_v11  ;;  %v1162_v23 = vmul.f32 1.442695, %v1132_v18  ;;  %v1126_v27 = vsub.f32 %v2951_v56, %v1097_v52  ;;  %v1127_v31 = vsub.f32 %v2949_v55, %v1097_v52 }
 0x5fd   : > { %2201 = vpow2.f32 %v1154_v13  ;;  %v1148_v28 = vmul.f32 1.442695, %v1125_v25  ;;  %v1129_v56 = vsub.f32 %v2979_v6, %v3029_v0  ;;  %v1133_v6 = vsub.f32 %v3004_v24, %v1109_v46 }
 0x5fe   : > { %2203 = vpow2.f32 %v1142_v17  ;;  %v1150_v59 = vmul.f32 1.442695, %v1126_v27  ;;  %v1152_v34 = vmul.f32 1.442695, %v1127_v31  ;;  %v1160_v42 = vmul.f32 1.442695, %v1131_v36 }
 0x5ff   : > { %2205 = vpow2.f32 %v1158_v7  ;;  %v1156_v39 = vmul.f32 1.442695, %v1129_v56  ;;  %v1164_v54 = vmul.f32 1.442695, %v1133_v6 }
 0x600   : > { %2207 = vpow2.f32 %v1144_v21 }
 0x601   : > { %2209 = vpow2.f32 %v1162_v23 }
 0x602   : > { %2211 = vpow2.f32 %v1146_v26 }
 0x603   : > { %2213 = vpow2.f32 %v1148_v28 }
 0x604   : > { %2215 = vpow2.f32 %v1150_v59 }
 0x605   : > { %2217 = vpow2.f32 %v1152_v34 }
 0x606   : > { %v3048_v22 = vpop.eup %2193  ;;  %2219 = vpow2.f32 %v1156_v39 }
 0x607   : > { %v3050_v19 = vpop.eup %2195  ;;  %1183 = vperm.xlu1 %2151, %v3048_v22   ;;  %2221 = vpow2.f32 %v1160_v42 }
 0x608   : > { %1186 = vperm.xlu0 %2152, %v3050_v19   ;;  %v3057_v60 = vpop.eup %2197  ;;  %2223 = vpow2.f32 %v1164_v54 }
 0x609   : > { %v3061_v29 = vpop.eup %2199 }
 0x60a   : > { %v3064_v30 = vpop.eup %2201 }
 0x60b   : > { %1189 = vperm.xlu1 %2151, %v3057_v60   ;;  %v3068_v32 = vpop.eup %2203 }
 0x60c   : > { %1213 = vperm.xlu0 %2152, %v3064_v30   ;;  %v3071_v33 = vpop.eup %2205 }
 0x60d   : > { %v3076_v35 = vpop.eup %2207 }
 0x60e   : > { %v3079_v55 = vpop.eup %2209 }
 0x60f   : > { %1192 = vperm.xlu1 %2151, %v3061_v29   ;;  %v3083_v41 = vpop.eup %2211 }
 0x610   : > { %1219 = vperm.xlu0 %2152, %v3071_v33   ;;  %v3087_v50 = vpop.eup %2213 }
 0x611   : > { %v3090_v62 = vpop.eup %2215 }
 0x612   : > { %v3093_v14 = vpop.eup %2217 }
 0x613   : > { %1195 = vperm.xlu1 %2151, %v3068_v32   ;;  %v3096_v0 = vpop.eup %2219 }
 0x614   : > { %1225 = vperm.xlu0 %2152, %v3079_v55   ;;  %v3099_v24 = vpop.eup %2221 }
 0x615   : > { %v3102_v1 = vpop.eup %2223 }
 0x617   : > { %1198 = vperm.xlu1 %2151, %v3076_v35  }
 0x61b   : > { %1201 = vperm.xlu1 %2151, %v3083_v41  }
 0x61f   : > { %1204 = vperm.xlu1 %2151, %v3087_v50  }
 0x623   : > { %1207 = vperm.xlu1 %2151, %v3090_v62  }
 0x627   : > { %1210 = vperm.xlu1 %2151, %v3093_v14  }
 0x62b   : > { %1216 = vperm.xlu1 %2151, %v3096_v0  }
 0x62f   : > { %1222 = vperm.xlu1 %2151, %v3099_v24  }
 0x633   : > { %1228 = vperm.xlu1 %2151, %v3102_v1  }
 0x682   : > { %v1184_v2 = vpop.permute.xlu1 %1183 }
 0x683   : > { %v1187_v10 = vpop.permute.xlu0 %1186  ;;  %v1233_v38 = vrot.slane %v1184_v2, %v2954_v57 }
 0x684   : > { %v1237_v7 = vrot.slane %v1187_v10, %v2957_v58 }
 0x686   : > { %v1190_v4 = vpop.permute.xlu1 %1189  ;;  %v1238_v34 = vsel %vm993_vm4, %v1237_v7, %v1233_v38 }
 0x687   : > { %v1214_v12 = vpop.permute.xlu0 %1213  ;;  %v1242_v21 = vrot.slane %v1190_v4, %v2954_v57 }
 0x688   : > { %v1278_v36 = vrot.slane %v1214_v12, %v2954_v57 }
 0x68a   : > { %v1193_v5 = vpop.permute.xlu1 %1192 }
 0x68b   : > { %v1246_v15 = vrot.slane %v1193_v5, %v2957_v58  ;;  %v1220_v16 = vpop.permute.xlu0 %1219 }
 0x68c   : > { %v1287_v42 = vrot.slane %v1220_v16, %v2954_v57 }
 0x68d   : > { %v1247_v26 = vsel %vm993_vm4, %v1246_v15, %v1242_v21 }
 0x68e   : > { %v1196_v44 = vpop.permute.xlu1 %1195  ;;  %v1302_v54 = vsel %vm1058_vm5, %v1247_v26, %v1238_v34  ;;  %v1582_v34 = vld [vmem:[#allocation14 + $0x10] sm:$0xff] }
 0x68f   : > { %v1251_v52 = vrot.slane %v1196_v44, %v2954_v57  ;;  %v1226_v2 = vpop.permute.xlu0 %1225 }
 0x692   : > { %v1199_v49 = vpop.permute.xlu1 %1198 }
 0x693   : > { %v1255_v17 = vrot.slane %v1199_v49, %v2957_v58 }
 0x695   : > { %v1256_v31 = vsel %vm993_vm4, %v1255_v17, %v1251_v52 }
 0x696   : > { %v1202_v8 = vpop.permute.xlu1 %1201  ;;  %v1303_v5 = vsel %vm1060_vm6, %v1256_v31, %v1302_v54  ;;  %v1585_v31 = vld [vmem:[#allocation14 + $0x28] sm:$0xff] }
 0x697   : > { %v1260_v27 = vrot.slane %v1202_v8, %v2954_v57 }
 0x69a   : > { %v1205_v11 = vpop.permute.xlu1 %1204 }
 0x69b   : > { %v1264_v23 = vrot.slane %v1205_v11, %v2957_v58  ;;  %v1296_v11 = vrot.slane %v1226_v2, %v2954_v57 }
 0x69d   : > { %v1265_v39 = vsel %vm993_vm4, %v1264_v23, %v1260_v27 }
 0x69e   : > { %v1208_v46 = vpop.permute.xlu1 %1207  ;;  %v1304_v49 = vsel %vm1062_vm7, %v1265_v39, %v1303_v5  ;;  %v1580_v39 = vld [vmem:[#allocation14] sm:$0xff] }
 0x69f   : > { %v1269_v59 = vrot.slane %v1208_v46, %v2954_v57 }
 0x6a2   : > { %v1211_v13 = vpop.permute.xlu1 %1210 }
 0x6a3   : > { %v1273_v25 = vrot.slane %v1211_v13, %v2957_v58 }
 0x6a5   : > { %v1274_v4 = vsel %vm993_vm4, %v1273_v25, %v1269_v59  ;;  %v1584_v59 = vld [vmem:[#allocation14 + $0x20] sm:$0xff] }
 0x6a6   : > { %v1217_v18 = vpop.permute.xlu1 %1216  ;;  %v1305_v46 = vsel %vm1064_vm8, %v1274_v4, %v1304_v49  ;;  %v1374_v49 = vld [vmem:[#allocation9 + $0x18] sm:$0xff] }
 0x6a7   : > { %v1282_v28 = vrot.slane %v1217_v18, %v2957_v58 }
 0x6a9   : > { %v1283_v44 = vsel %vm993_vm4, %v1282_v28, %v1278_v36  ;;  %v1586_v28 = vld [vmem:[#allocation14 + $0x30] sm:$0xff]  ;;  %v1581_v36 = vld [vmem:[#allocation14 + $0x8] sm:$0xff] }
 0x6aa   : > { %v1223_v56 = vpop.permute.xlu1 %1222  ;;  %v1306_v13 = vsel %vm1066_vm9, %v1283_v44, %v1305_v46  ;;  %v1378_v46 = vld [vmem:[#allocation9 + $0x38] sm:$0xff] }
 0x6ab   : > { %v1291_v6 = vrot.slane %v1223_v56, %v2957_v58  ;;  %v1583_v56 = vld [vmem:[#allocation14 + $0x18] sm:$0xff] }
 0x6ad   : > { %v1292_v8 = vsel %vm993_vm4, %v1291_v6, %v1287_v42 }
 0x6ae   : > { %v1229_v10 = vpop.permute.xlu1 %1228  ;;  %v1307_v16 = vsel %vm1068_vm10, %v1292_v8, %v1306_v13  ;;  %v1376_v8 = vld [vmem:[#allocation9 + $0x28] sm:$0xff] }
 0x6af   : > { %v1300_v12 = vrot.slane %v1229_v10, %v2957_v58  ;;  %v1372_v10 = vld [vmem:[#allocation9 + $0x8] sm:$0xff] }
 0x6b1   : > { %v1301_v15 = vsel %vm993_vm4, %v1300_v12, %v1296_v11  ;;  %v1373_v11 = vld [vmem:[#allocation9 + $0x10] sm:$0xff] }
 0x6b2   : > { %v1308_v17 = vsel %vm1070_vm11, %v1301_v15, %v1307_v16  ;;  %v1375_v15 = vld [vmem:[#allocation9 + $0x20] sm:$0xff] }
 0x6b3   : > { %v1310_v18 = vsel %vm1073_vm12, %v1308_v17, 0.0  ;;  %v1371_v16 = vld [vmem:[#allocation9] sm:$0xff] }
 0x6b4   : > { %1311 = vadd.xlane.f32.xlu0 %v1310_v18  ;;  %v1377_v18 = vld [vmem:[#allocation9 + $0x30] sm:$0xff] }
 0x73d   : > { %v1312_v7 = vpop.xlane.xlu0 %1311 }
 0x73e   : > { %2225 = vrcp.f32 %v1312_v7  ;;  %v1379_v7 = vld [vmem:[#allocation9 + $0x40] sm:$0xff] }
 0x74b   : > { %v2226_v38 = vpop.eup %2225 }
 0x74c   : > { %v1334_v57 = vrot.slane %v2226_v38, %v1096_v20  ;;  %v1318_v21 = vrot.slane %v2226_v38, %v2889_v61  ;;  %v1346_v52 = vrot.slane %v2226_v38, %v1108_v45  ;;  %v1322_v27 = vrot.slane %v2226_v38, %v1084_v37 }
 0x74d   : > { %v1326_v45 = vrot.slane %v2226_v38, %v1088_v51  ;;  %v1330_v37 = vrot.slane %v2226_v38, %v1092_v9  ;;  %v1338_v51 = vrot.slane %v2226_v38, %v1100_v43  ;;  %v1342_v9 = vrot.slane %v2226_v38, %v1104_v63  ;;  %v1594_v43 = vld [vmem:[#allocation14 + $0x70] sm:$0xff]  ;;  %v1592_v63 = vld [vmem:[#allocation14 + $0x60] sm:$0xff] }
 0x74e   : > { %v1363_v58 = vmul.f32 %v3090_v62, %v1334_v57  ;;  %v1355_v23 = vmul.f32 %v3048_v22, %v1318_v21  ;;  %v1369_v25 = vmul.f32 %v3079_v55, %v1346_v52  ;;  %v1356_v26 = vmul.f32 %v3050_v19, %v1318_v21  ;;  %v1595_v62 = vld [vmem:[#allocation14 + $0x78] sm:$0xff] }
 0x74f   : > { %v1357_v61 = vmul.f32 %v3057_v60, %v1322_v27  ;;  %v1358_v20 = vmul.f32 %v3061_v29, %v1322_v27  ;;  %v1359_v22 = vmul.f32 %v3068_v32, %v1326_v45  ;;  %v1360_v19 = vmul.f32 %v3076_v35, %v1326_v45  ;;  %1991 = vmatpush3.msra.mxu1 %v1595_v62 }
 0x750   : > { %1429 = vperm.xlu0 %2152, %v1363_v58   ;;  %1389 = vperm.xlu1 %2151, %v1355_v23   ;;  %v1361_v60 = vmul.f32 %v3083_v41, %v1330_v37  ;;  %v1364_v29 = vmul.f32 %v3093_v14, %v1334_v57  ;;  %v1365_v32 = vmul.f32 %v3064_v30, %v1338_v51  ;;  %v1593_v30 = vld [vmem:[#allocation14 + $0x68] sm:$0xff]  ;;  %v1590_v14 = vld [vmem:[#allocation14 + $0x50] sm:$0xff] }
 0x751   : > { %v1366_v35 = vmul.f32 %v3096_v0, %v1338_v51  ;;  %v1367_v55 = vmul.f32 %v3071_v33, %v1342_v9  ;;  %v1368_v41 = vmul.f32 %v3099_v24, %v1342_v9  ;;  %1992 = vmatprep.subr.mxu1 %v2543_v3  ;;  %v1591_v33 = vld [vmem:[#allocation14 + $0x58] sm:$0xff]  ;;  %v1589_v0 = vld [vmem:[#allocation14 + $0x48] sm:$0xff]  ;;  %v1588_v24 = vld [vmem:[#allocation14 + $0x40] sm:$0xff] }
 0x752   : > { %1993 = vmatpush3.msra.mxu1 %v1594_v43  ;;  %v1381_v51 = vld [vmem:[#allocation9 + $0x50] sm:$0xff]  ;;  %v1382_v43 = vld [vmem:[#allocation9 + $0x58] sm:$0xff] }
 0x753   : > { %1994 = vmatprep.subr.mxu1 %v2543_v3 }
 0x754   : > { %1459 = vperm.xlu0 %2152, %v1369_v25   ;;  %1394 = vperm.xlu1 %2151, %v1356_v26  }
 0x755   : > { %1995 = vmatpush3.msra.mxu1 %v1593_v30 }
 0x756   : > { %1996 = vmatprep.subr.mxu1 %v2543_v3 }
 0x757   : > { %1997 = vmatpush3.msra.mxu1 %v1592_v63 }
 0x758   : > { %1571 = vrot.lane.b32.xlu0 %v2871_v47, %s2542_s28  ;;  %1399 = vperm.xlu1 %2151, %v1357_v61   ;;  %v1362_v47 = vmul.f32 %v3087_v50, %v1330_v37  ;;  %v1370_v50 = vmul.f32 %v3102_v1, %v1346_v52  ;;  %v1587_v1 = vld [vmem:[#allocation14 + $0x38] sm:$0xff] }
 0x759   : > { %1998 = vmatprep.subr.mxu1 %v2543_v3 }
 0x75a   : > { %1999 = vmatpush3.msra.mxu1 %v1591_v33 }
 0x75b   : > { %2000 = vmatprep.subr.mxu1 %v2543_v3 }
 0x75c   : > { %1404 = vperm.xlu1 %2151, %v1358_v20   ;;  %2001 = vmatpush3.msra.mxu1 %v1590_v14 }
 0x75d   : > { %2002 = vmatprep.subr.mxu1 %v2543_v3 }
 0x75e   : > { %2003 = vmatpush3.msra.mxu1 %v1589_v0 }
 0x75f   : > { %2004 = vmatprep.subr.mxu1 %v2543_v3 }
 0x760   : > { %1409 = vperm.xlu1 %2151, %v1359_v22   ;;  %2005 = vmatpush3.msra.mxu1 %v1588_v24 }
 0x761   : > { %2006 = vmatprep.subr.mxu1 %v2543_v3 }
 0x762   : > { %2007 = vmatpush3.msra.mxu1 %v1587_v1 }
 0x763   : > { %2008 = vmatprep.subr.mxu1 %v2543_v3 }
 0x764   : > { %1414 = vperm.xlu1 %2151, %v1360_v19   ;;  %2009 = vmatpush3.msra.mxu1 %v1586_v28 }
 0x765   : > { %2010 = vmatprep.subr.mxu1 %v2543_v3 }
 0x766   : > { %2011 = vmatpush3.msra.mxu1 %v1585_v31 }
 0x767   : > { %2012 = vmatprep.subr.mxu1 %v2543_v3 }
 0x768   : > { %1419 = vperm.xlu1 %2151, %v1361_v60   ;;  %2013 = vmatpush3.msra.mxu1 %v1584_v59 }
 0x769   : > { %2014 = vmatprep.subr.mxu1 %v2543_v3 }
 0x76a   : > { %2015 = vmatpush3.msra.mxu1 %v1583_v56 }
 0x76b   : > { %2016 = vmatprep.subr.mxu1 %v2543_v3 }
 0x76c   : > { %1424 = vperm.xlu1 %2151, %v1362_v47   ;;  %2017 = vmatpush3.msra.mxu1 %v1582_v34 }
 0x76d   : > { %2018 = vmatprep.subr.mxu1 %v2543_v3 }
 0x76e   : > { %2019 = vmatpush3.msra.mxu1 %v1581_v36 }
 0x76f   : > { %2020 = vmatprep.subr.mxu1 %v2543_v3  ;;  %v1380_v3 = vld [vmem:[#allocation9 + $0x48] sm:$0xff] }
 0x770   : > { %1434 = vperm.xlu1 %2151, %v1364_v29   ;;  %2021 = vmatpush3.msra.mxu1 %v1580_v39  ;;  %v1383_v39 = vld [vmem:[#allocation9 + $0x60] sm:$0xff] }
 0x774   : > { %1439 = vperm.xlu1 %2151, %v1365_v32  }
 0x778   : > { %1444 = vperm.xlu1 %2151, %v1366_v35  }
 0x77c   : > { %1449 = vperm.xlu1 %2151, %v1367_v55  }
 0x780   : > { %1454 = vperm.xlu1 %2151, %v1368_v41  }
 0x784   : > { %1464 = vperm.xlu1 %2151, %v1370_v50  }
 0x788   : > { %1574 = vrot.lane.b32.xlu1 %v3172_v53, %s2546_s17 }
 0x78c   : > { %1680 = vrot.lane.b32.xlu1 %v3172_v53, %s2544_s25 }
 0x7cb   : > { %v1390_v6 = vpop.permute.xlu1 %1389  ;;  %v1430_v38 = vpop.permute.xlu0 %1429 }
 0x7cc   : > { %v1467_v25 = vmul.f32 %v1390_v6, %v1371_v16  ;;  %v1475_v20 = vmul.f32 %v1430_v38, %v1379_v7 }
 0x7ce   : > { %v1483_v35 = vsel %vm548_vm1, %v1467_v25, 0.0  ;;  %v1519_v41 = vsel %vm548_vm1, %v1475_v20, 0.0 }
 0x7cf   : > { %v1395_v42 = vpop.permute.xlu1 %1394 }
 0x7d0   : > { %v1468_v57 = vmul.f32 %v1395_v42, %v1372_v10  ;;  %v1460_v10 = vpop.permute.xlu0 %1459 }
 0x7d2   : > { %v1484_v22 = vsel %vm548_vm1, %v1468_v57, 0.0 }
 0x7d3   : > { %v1400_v54 = vpop.permute.xlu1 %1399  ;;  %v1485_v50 = vadd.f32 %v1484_v22, %v1483_v35 }
 0x7d4   : > { %v1469_v21 = vmul.f32 %v1400_v54, %v1373_v11 }
 0x7d5   : > { %v1486_v1 = vrot.slane %v1485_v50, 4 }
 0x7d6   : > { %v1492_v19 = vsel %vm548_vm1, %v1469_v21, 0.0 }
 0x7d7   : > { %v1405_v2 = vpop.permute.xlu1 %1404  ;;  %v1487_v54 = vadd.f32 %v1486_v1, %v1485_v50 }
 0x7d8   : > { %v1470_v13 = vmul.f32 %v1405_v2, %v1374_v49 }
 0x7d9   : > { %v1488_v16 = vrot.slane %v1487_v54, 2 }
 0x7da   : > { %v1493_v26 = vsel %vm548_vm1, %v1470_v13, 0.0 }
 0x7db   : > { %v1410_v4 = vpop.permute.xlu1 %1409  ;;  %v1494_v60 = vadd.f32 %v1493_v26, %v1492_v19 }
 0x7dc   : > { %v1471_v23 = vmul.f32 %v1410_v4, %v1375_v15 }
 0x7dd   : > { %v1495_v33 = vrot.slane %v1494_v60, 4 }
 0x7de   : > { %v1501_v47 = vsel %vm548_vm1, %v1471_v23, 0.0 }
 0x7df   : > { %v1415_v5 = vpop.permute.xlu1 %1414  ;;  %v1496_v34 = vadd.f32 %v1495_v33, %v1494_v60 }
 0x7e0   : > { %v1472_v17 = vmul.f32 %v1415_v5, %v1376_v8  ;;  %v1384_v5 = vld [vmem:[#allocation9 + $0x68] sm:$0xff]  ;;  %v1385_v8 = vld [vmem:[#allocation9 + $0x70] sm:$0xff] }
 0x7e1   : > { %v1497_v11 = vrot.slane %v1496_v34, 2 }
 0x7e2   : > { %v1502_v45 = vsel %vm548_vm1, %v1472_v17, 0.0 }
 0x7e3   : > { %v1420_v44 = vpop.permute.xlu1 %1419  ;;  %v1503_v9 = vadd.f32 %v1502_v45, %v1501_v47  ;;  %v1498_v21 = vadd.f32 %v1497_v11, %v1496_v34  ;;  %v1899_v11 = vld [vmem:[%s3291_s8] ss:$0 sm:$0xff] }
 0x7e4   : > { %v1473_v27 = vmul.f32 %v1420_v44, %v1377_v18  ;;  %v1386_v18 = vld [vmem:[#allocation9 + $0x78] sm:$0xff] }
 0x7e5   : > { %v1504_v0 = vrot.slane %v1503_v9, 4 }
 0x7e6   : > { %v1510_v55 = vsel %vm548_vm1, %v1473_v27, 0.0  ;;  %v1489_v27 = vadd.f32 %v1488_v16, %v1487_v54 }
 0x7e7   : > { %v1425_v12 = vpop.permute.xlu1 %1424  ;;  %v1505_v42 = vadd.f32 %v1504_v0, %v1503_v9 }
 0x7e8   : > { %v1474_v58 = vmul.f32 %v1425_v12, %v1378_v46 }
 0x7e9   : > { %v1506_v13 = vrot.slane %v1505_v42, 2 }
 0x7ea   : > { %v1511_v37 = vsel %vm548_vm1, %v1474_v58, 0.0 }
 0x7eb   : > { %v1435_v52 = vpop.permute.xlu1 %1434  ;;  %v1512_v62 = vadd.f32 %v1511_v37, %v1510_v55  ;;  %v1507_v25 = vadd.f32 %v1506_v13, %v1505_v42  ;;  %v1499_v37 = vrot.slane %v1498_v21, 1 }
 0x7ec   : > { %v1476_v61 = vmul.f32 %v1435_v52, %v1380_v3  ;;  %v1481_v3 = vmul.f32 %v1460_v10, %v1385_v8 }
 0x7ed   : > { %v1513_v28 = vrot.slane %v1512_v62, 4  ;;  %v1500_v50 = vadd.f32 %v1499_v37, %v1498_v21 }
 0x7ee   : > { %v1520_v29 = vsel %vm548_vm1, %v1476_v61, 0.0  ;;  %v1546_v45 = vsel %vm548_vm1, %v1481_v3, 0.0 }
 0x7ef   : > { %v1440_v32 = vpop.permute.xlu1 %1439  ;;  %v1521_v30 = vadd.f32 %v1520_v29, %v1519_v41  ;;  %v1514_v2 = vadd.f32 %v1513_v28, %v1512_v62 }
 0x7f0   : > { %v1477_v63 = vmul.f32 %v1440_v32, %v1381_v51  ;;  %v1508_v51 = vrot.slane %v1507_v25, 1  ;;  %v1490_v32 = vrot.slane %v1489_v27, 1 }
 0x7f1   : > { %v1522_v31 = vrot.slane %v1521_v30, 4  ;;  %v1515_v17 = vrot.slane %v1514_v2, 2 }
 0x7f2   : > { %v1528_v59 = vsel %vm548_vm1, %v1477_v63, 0.0  ;;  %v1509_v63 = vadd.f32 %v1508_v51, %v1507_v25  ;;  %v1491_v33 = vadd.f32 %v1490_v32, %v1489_v27 }
 0x7f3   : > { %v1445_v14 = vpop.permute.xlu1 %1444  ;;  %v1523_v44 = vadd.f32 %v1522_v31, %v1521_v30  ;;  %v1516_v61 = vadd.f32 %v1515_v17, %v1514_v2 }
 0x7f4   : > { %v1478_v24 = vmul.f32 %v1445_v14, %v1382_v43  ;;  %v1563_v28 = vsel %vm1058_vm5, %v1500_v50, %v1491_v33 }
 0x7f5   : > { %v1524_v7 = vrot.slane %v1523_v44, 2  ;;  %v1517_v35 = vrot.slane %v1516_v61, 1 }
 0x7f6   : > { %v1529_v56 = vsel %vm548_vm1, %v1478_v24, 0.0 }
 0x7f7   : > { %v1530_v36 = vadd.f32 %v1529_v56, %v1528_v59  ;;  %v1450_v6 = vpop.permute.xlu1 %1449  ;;  %v1525_v22 = vadd.f32 %v1524_v7, %v1523_v44  ;;  %v1518_v14 = vadd.f32 %v1517_v35, %v1516_v61  ;;  %v1564_v56 = vsel %vm1060_vm6, %v1509_v63, %v1563_v28 }
 0x7f8   : > { %v1479_v49 = vmul.f32 %v1450_v6, %v1383_v39 }
 0x7f9   : > { %v1531_v4 = vrot.slane %v1530_v36, 4  ;;  %v1526_v41 = vrot.slane %v1525_v22, 1 }
 0x7fa   : > { %v1537_v38 = vsel %vm548_vm1, %v1479_v49, 0.0 }
 0x7fb   : > { %v1532_v46 = vadd.f32 %v1531_v4, %v1530_v36  ;;  %v1455_v12 = vpop.permute.xlu1 %1454  ;;  %v1527_v1 = vadd.f32 %v1526_v41, %v1525_v22  ;;  %v1565_v36 = vsel %vm1062_vm7, %v1518_v14, %v1564_v56 }
 0x7fc   : > { %v1480_v15 = vmul.f32 %v1455_v12, %v1384_v5  ;;  %v1572_v5 = vpop.permute.xlu0 %1571 }
 0x7fd   : > { %v1533_v58 = vrot.slane %v1532_v46, 2  ;;  %v1566_v6 = vsel %vm1064_vm8, %v1527_v1, %v1565_v36 }
 0x7fe   : > { %v1538_v57 = vsel %vm548_vm1, %v1480_v15, 0.0 }
 0x7ff   : > { %v1539_v23 = vadd.f32 %v1538_v57, %v1537_v38  ;;  %v1465_v52 = vpop.permute.xlu1 %1464  ;;  %v1534_v60 = vadd.f32 %v1533_v58, %v1532_v46 }
 0x800   : > { %v1482_v26 = vmul.f32 %v1465_v52, %v1386_v18 }
 0x801   : > { %v1540_v20 = vrot.slane %v1539_v23, 4  ;;  %v1535_v62 = vrot.slane %v1534_v60, 1 }
 0x802   : > { %v1547_v19 = vsel %vm548_vm1, %v1482_v26, 0.0 }
 0x803   : > { %v1541_v47 = vadd.f32 %v1540_v20, %v1539_v23  ;;  %v1548_v29 = vadd.f32 %v1547_v19, %v1546_v45  ;;  %v1536_v31 = vadd.f32 %v1535_v62, %v1534_v60  ;;  %v1575_v4 = vpop.permute.xlu1 %1574 }
 0x805   : > { %v1542_v9 = vrot.slane %v1541_v47, 2  ;;  %v1549_v55 = vrot.slane %v1548_v29, 4  ;;  %v1567_v54 = vsel %vm1066_vm9, %v1536_v31, %v1566_v6 }
 0x807   : > { %v1543_v43 = vadd.f32 %v1542_v9, %v1541_v47  ;;  %v1550_v30 = vadd.f32 %v1549_v55, %v1548_v29  ;;  %v1681_v38 = vpop.permute.xlu1 %1680 }
 0x809   : > { %v1544_v0 = vrot.slane %v1543_v43, 1  ;;  %v1551_v24 = vrot.slane %v1550_v30, 2 }
 0x80b   : > { %v1552_v59 = vadd.f32 %v1551_v24, %v1550_v30  ;;  %v1545_v34 = vadd.f32 %v1544_v0, %v1543_v43 }
 0x80d   : > { %v1553_v39 = vrot.slane %v1552_v59, 1  ;;  %v1568_v2 = vsel %vm1068_vm10, %v1545_v34, %v1567_v54 }
 0x80f   : > { %v1554_v42 = vadd.f32 %v1553_v39, %v1552_v59 }
 0x811   : > { %v1569_v44 = vsel %vm1070_vm11, %v1554_v42, %v1568_v2 }
 0x812   : > { %v1577_v49 = vsel %vm548_vm1, %v1569_v44, %v1572_v5 }
 0x813   : > { %v1578_v8 = vsel %vm550_vm2, %v1577_v49, %v1575_v4 }
 0x814   : > { %v1579_v10 = vsel %vm552_vm3, %v1578_v8, %v3172_v53 }
 0x815   : > { %2023 = vmatmul.mubr.f32.vlgmr.msra.gmra.mxu1 %v1579_v10 }
 0x8d5   : > { %v1669_v46 = vpop.f32.mrf.mxu1 }
 0x8d6   : > { %v1670_v12 = vadd.f32 %v1899_v11, %v1669_v46 }
 0x8d7   : > { %v2024_v13 = vpop.f32.mrf.mxu1 }
 0x8d8   : > { %2227 = vtanh.f32 %v1670_v12  ;;  %v1900_v16 = vmul.f32 -1.442695, %v1670_v12 }
 0x8da   : > { %2229 = vpow2.f32 %v1900_v16 }
 0x8e5   : > { %v2228_v15 = vpop.eup %2227 }
 0x8e6   : > { %1685 = vrot.lane.b32.xlu0 %v2228_v15, %s2546_s17 }
 0x8e7   : > { %v2230_v17 = vpop.eup %2229 }
 0x8e8   : > { %v1676_v18 = vadd.f32 1.0, %v2230_v17 }
 0x8ea   : > { %2231 = vrcp.f32 %v1676_v18 }
 0x8f7   : > { %v2232_v3 = vpop.eup %2231 }
 0x8f8   : > { %v1683_v57 = vmul.f32 %v2232_v3, %v1681_v38 }
 0x958   : > { %v1686_v7 = vpop.permute.xlu0 %1685 }
 0x959   : > { %v1688_v53 = vmul.f32 %v2232_v3, %v1686_v7 }
 0x95b   : > { %1690 = vrot.lane.b32.xlu0 %v1688_v53, %s2546_s17 }
 0x9cd   : > { %v1691_v21 = vpop.permute.xlu0 %1690 }
 0x9ce   : > { %v1693_v58 = vadd.f32 %v1691_v21, %v1683_v57 }
 0x9d0   : > { %2233 = vtanh.f32 %v1693_v58 }
 0x9dd   : > { %v2234_v23 = vpop.eup %2233 }
 0x9de   : > { %1696 = vrot.lane.b32.xlu1 %v2234_v23, %s2546_s17 }
 0x9e2   : > { %1706 = vrot.lane.b32.xlu1 %v2863_v40, %s2546_s17 }
 0xa50   : > { %v1697_v52 = vpop.permute.xlu1 %1696 }
 0xa51   : > { %v1699_v25 = vmul.f32 %v2232_v3, %v1697_v52 }
 0xa53   : > { %1702 = vrot.lane.b32.xlu0 %v1699_v25, %s2542_s28  ;;  %s2446_s28 = scalar_lea.vmem %s3239_s3, 128 }
 0xa54   : > { %v1707_v61 = vpop.permute.xlu1 %1706  ;;  %p2447_p3 = scmp.ne.s32.totalorder %s3239_s3, %s2446_s28 }
 0xa56   : > { %p2448_p0 = pnand %p2447_p3, %p3335_p4 }
 0xa57   : > { %1710 = vrot.lane.b32.xlu0 %v1693_v58, %s2544_s25  ;;  %s2549_s25 = smov [#allocation17]  }
 0xa58   : > { %p2449_p7 = pneg %p2448_p0  ;;  %s2450_s26 = sshll.u32 %s2549_s25, 4  ;;  %s2451_s26 = int_to_ptr.vmem [resolvable:$false] %s2450_s26 }
 0xa59   : > { %s2452_s20 = scalar_lea.vmem %s2451_s26, 256  ;;  %p2453_p9 = scmp.lt.s32.totalorder %s3239_s3, %s2451_s26 }
 0xa5a   : > { %p2454_p6 = scmp.lt.s32.totalorder %s2452_s20, %s2446_s28 }
 0xa5c   : > { %p2455_p12 = por %p2454_p6, %p2453_p9 }
 0xa5e   : > { %p2456_p13 = pnand %p2455_p12, %p2449_p7 }
 0xac5   : > { %v1703_v26 = vpop.permute.xlu0 %1702 }
 0xac6   : > { %v1713_v27 = vsel %vm548_vm1, %v2875_v48, %v1703_v26 }
 0xac7   : > { %v1714_v40 = vsel %vm550_vm2, %v1713_v27, %v1707_v61 }
 0xac9   : > { %v1711_v20 = vpop.permute.xlu0 %1710 }
 0xaca   : > { %v1715_v45 = vsel %vm552_vm3, %v1714_v40, %v1711_v20 }
 0xacb   : > { %1716 = vst [vmem:[#allocation2] sm:$0xff] %v1715_v45  ;;  %1717 = vst [vmem:[%s526_s4] sm:$0xff] %v1715_v45 }
 0xacc   : > { %2459 = shalt.err (!%p2456_p13)
}
 0xacd   : > { %s2460_s9 = scalar_lea.hbm %s3237_s30, 128  ;;  %s2464_s0 = scalar_lea.hbm %s3295_s12, 512 }
 0xace   : > { %p2461_p2 = scmp.ne.s32.totalorder %s3237_s30, %s2460_s9  ;;  %p2465_p11 = scmp.lt.s32.totalorder %s3237_s30, %s3295_s12 }
 0xacf   : > { %p2466_p10 = scmp.lt.s32.totalorder %s2464_s0, %s2460_s9 }
 0xad0   : > { %p2462_p5 = pnand %p2461_p2, %p3335_p4 }
 0xad1   : > { %p2467_p1 = por %p2466_p10, %p2465_p11 }
 0xad2   : > { %p2463_p8 = pneg %p2462_p5 }
 0xad4   : > { %p2468_p3 = pnand %p2467_p1, %p2463_p8 }
 0xad6   : > { %2471 = shalt.err (!%p2468_p3)
}
 0xad7   : > { %2055 = dma.vmem_to_hbm [thread:$0]  (%p3335_p4), %s3239_s3, 128, %s3237_s30, %s1719_s27  }
 0xad8 PF: > { %p2102_p0 = scmp.ge.s32.totalorder %s2530_s24, 2  ;;  %s1744_s5 = sand.u32 1, %s2518_s21  }
 0xad9   : > { %p3336_p7 = scmp.ne.s32.totalorder %s3320_s14, 0  ;;  %s1745_s2 = scalar_lea.sflag [#allocation5], %s1744_s5 }
 0xadb   : > { %p2084_p9 = pnand %p2102_p0, %p3336_p7 }
 0xadd   : > { %p2085_p6 = pneg %p2084_p9 }
 0xadf   : > { %2513 = dma.done.wait (%p2085_p6), %s1745_s2, 128  }
 0xae0   : > { %2515 = vsyncadd (%p2085_p6), %s1745_s2, 4294967168  ;;  %p29_p12 = scmp.ge.s32.totalorder %s2740_s16, 6   ;;  %s3337_s21 = smov %s2522_s22 }
 0xae1   : > { %s3338_s22 = smov %s2526_s23  ;;  %s3339_s23 = smov %s2752_s18 }
 0xae2   : > { %s3340_s24 = smov %s2740_s16  ;;  %31 = sbr.rel (!%p29_p12) target bundleno = 17 (0x11), region = 146 }
 0xae7   :  { %1750 = vsyncpa [#allocation4], 1 }
 0xae8   :  { %1752 = vsyncpa [#allocation4 + $0x1], 1 }
 0xae9   :  { %1753 = vsyncpa [#allocation7], 1 }
 0xaea   :  { %1755 = vsyncpa [#allocation7 + $0x1], 1 }
 0xaeb   :  { %1756 = vsyncpa [#allocation10], 1 }
 0xaec   :  { %1757 = vsyncpa [#allocation13], 1 }
 0xaed   :  { %1758 = vsyncpa [#allocation16], 1 }
 0xaee   :  { %1759 = vsyncpa [#allocation5], 1 }
 0xaef   :  { %1761 = vsyncpa [#allocation5 + $0x1], 1 }

</bundles_post_ra>
